<compile_context>
chip_gen: v7x
topology: tpu7x:2x2x1
jax: 0.10.0
libtpu: 0.0.40
codegen_flags: <defaults>
</compile_context>

<pallas_src>
import functools

import jax
import jax.numpy as jnp
from jax.experimental import pallas as pl
from jax.experimental.pallas import tpu as pltpu


def _layer_norm(x, w, b, eps):
    # PyTorch LayerNorm: biased variance over the last dim (f32 math).
    mean = jnp.mean(x, axis=-1, keepdims=True)
    var = jnp.mean(jnp.square(x - mean), axis=-1, keepdims=True)
    return (x - mean) * jax.lax.rsqrt(var + eps) * w + b


def sasrec_layer_kernel(x_ref, pad_ref,
                        wqkv_ref, bqkv_ref, wo_ref, bo_ref,
                        ln1w_ref, ln1b_ref,
                        w1_ref, b1_ref, w2_ref, b2_ref,
                        ln2w_ref, ln2b_ref,
                        o_ref,
                        *, n_head, eps, approx_softmax):
    layer = pl.program_id(1)

    # Seed the resident residual stream.  o_ref keeps the same block index for
    # every layer, so it lives in VMEM across the whole layer loop and is only
    # written back to HBM when the batch block changes.
    @pl.when(layer == 0)
    def _():
        o_ref[...] = x_ref[...]

    x3 = o_ref[...]                              # [bt, L, D] f32 residual
    bt, L, D = x3.shape
    dh = D // n_head
    M = bt * L

    x = x3.reshape(M, D)                         # flatten (B, L) -> M
    xb = x.astype(jnp.bfloat16)

    # ---- fused QKV projection: one [M,D]x[D,3D] bf16 MXU matmul, f32 acc.
    # The 1/sqrt(dh) softmax scale is pre-folded into the Q columns of wqkv
    # and bqkv, so no per-score multiply is needed below.
    qkv = jnp.dot(xb, wqkv_ref[0],
                  preferred_element_type=jnp.float32) + bqkv_ref[0]   # [M, 3D]

    # ---- additive attention mask built in-kernel (causal from iota + padding)
    row = jax.lax.broadcasted_iota(jnp.int32, (L, L), 0)
    col = jax.lax.broadcasted_iota(jnp.int32, (L, L), 1)
    causal = jnp.where(col > row, -1e30, 0.0).astype(jnp.float32)     # [L, L]
    add_mask = causal[None, :, :] + pad_ref[...]                      # [bt,L,L]

    # ---- multi-head self attention.
    # Per-head Q/K/V slices are lane slices at offsets h*dh; keep dh a multiple
    # of 128 (as in the demo shapes) so they lower to unmasked vld copies.
    # TODO(synk): for dh < 128 do a single pltpu.einshape relayout per layer
    # instead of masked per-head lane slices.
    # TODO(synk): if n_head grows beyond ~4, switch the static Python loop to
    # lax.fori_loop(..., unroll=True) to bound per-head live ranges.
    head_outs = []
    for h in range(n_head):                      # static, unrolled
        qh = qkv[:, 0 * D + h * dh: 0 * D + (h + 1) * dh]
        kh = qkv[:, 1 * D + h * dh: 1 * D + (h + 1) * dh]
        vh = qkv[:, 2 * D + h * dh: 2 * D + (h + 1) * dh]
        qh = qh.reshape(bt, L, dh).astype(jnp.bfloat16)
        kh = kh.reshape(bt, L, dh).astype(jnp.bfloat16)
        vh = vh.reshape(bt, L, dh).astype(jnp.bfloat16)
        s = jnp.einsum('bqd,bkd->bqk', qh, kh,
                       preferred_element_type=jnp.float32)            # [bt,L,L]
        s = s + add_mask
        s = s - jnp.max(s, axis=-1, keepdims=True)
        p = jnp.exp(s)
        denom = jnp.sum(p, axis=-1, keepdims=True)
        if approx_softmax:
            # EUP approximate reciprocal (separate issue slot, ~free).  Small
            # relative error vs torch softmax; fine for eval ranking.
            p = p * pl.reciprocal(denom, approx=True)
        else:
            p = p / denom
        oh = jnp.einsum('bqk,bkd->bqd', p.astype(jnp.bfloat16), vh,
                        preferred_element_type=jnp.float32)           # [bt,L,dh]
        head_outs.append(oh.astype(jnp.bfloat16))

    # Single full-width output projection: concatenate head outputs (aligned
    # lane copy) and do ONE [M,D]x[D,D] bf16 MXU matmul with f32 accumulation.
    concat = jnp.concatenate(head_outs, axis=-1).reshape(M, D)        # [M, D]
    attn = jnp.dot(concat, wo_ref[0],
                   preferred_element_type=jnp.float32) + bo_ref[0]

    # residual + post-LayerNorm (norm_first=False); dropout identity in eval.
    y = _layer_norm(x + attn, ln1w_ref[0], ln1b_ref[0], eps)

    # ---- feed-forward: linear1 -> relu -> linear2 (bf16 MXU, f32 accumulate)
    h1 = jnp.dot(y.astype(jnp.bfloat16), w1_ref[0],
                 preferred_element_type=jnp.float32) + b1_ref[0]
    h1 = jnp.maximum(h1, 0.0)
    ff = jnp.dot(h1.astype(jnp.bfloat16), w2_ref[0],
                 preferred_element_type=jnp.float32) + b2_ref[0]
    z = _layer_norm(y + ff, ln2w_ref[0], ln2b_ref[0], eps)

    o_ref[...] = z.reshape(bt, L, D)


def sasrec_transformer(x, pad_add, params, *, n_head, eps,
                       batch_block=None, approx_softmax=True):
    """x: [B, L, D] f32.  pad_add: [B, 1, L] f32 additive key-padding mask.

    batch_block: elements of B per grid step.  Default B (nb=1), which is the
    right choice on single-TensorCore chips (v5e/v6e).  On v7x pass B//2 so the
    "parallel" batch axis can be sharded across the two TensorCores and the
    per-TC VMEM stays under the 64 MiB budget.  At production sizes pick
    batch_block so M = batch_block * L >= 512 to amortize MXU fill/drain.
    """
    B, L, D = x.shape
    n_layer = params['wqkv'].shape[0]
    if batch_block is None:
        batch_block = B
    nb = B // batch_block
    bt = batch_block

    kernel = functools.partial(sasrec_layer_kernel, n_head=n_head, eps=eps,
                               approx_softmax=approx_softmax)

    # TODO(synk): x is only read at layer 0; at production sizes reclaim its
    # second pipeline buffer with pipeline_mode=pl.Buffered(1) on this spec.
    in_specs = [
        pl.BlockSpec((bt, L, D), lambda b, l: (b, 0, 0)),   # x (read at layer 0)
        pl.BlockSpec((bt, 1, L), lambda b, l: (b, 0, 0)),   # padding mask
    ]
    args = [x, pad_add]
    param_order = ['wqkv', 'bqkv', 'wo', 'bo', 'ln1w', 'ln1b',
                   'w1', 'b1', 'w2', 'b2', 'ln2w', 'ln2b']
    for name in param_order:
        p = params[name]                                    # [n_layer, a, b]
        in_specs.append(pl.BlockSpec((1,) + p.shape[1:], lambda b, l: (l, 0, 0)))
        args.append(p)

    return pl.pallas_call(
        kernel,
        out_shape=jax.ShapeDtypeStruct((B, L, D), jnp.float32),
        grid_spec=pltpu.PrefetchScalarGridSpec(
            num_scalar_prefetch=0,
            grid=(nb, n_layer),
            in_specs=in_specs,
            # Same block index across the layer axis -> o_ref is the resident
            # residual accumulator; written back to HBM per batch block.
            out_specs=pl.BlockSpec((bt, L, D), lambda b, l: (b, 0, 0)),
        ),
        compiler_params=pltpu.CompilerParams(
            dimension_semantics=("parallel", "arbitrary"),
            # 128 MiB physical on v5e/v6e (raise further if bt grows);
            # keep actual usage well under 64 MiB per TC on v7x.
            vmem_limit_bytes=64 * 1024 * 1024),
    )(*args)


def init_params(key, n_layer, D, hidden, n_head):
    ks = jax.random.split(key, 6)

    def nrm(k, shape, scale=0.02):
        return (scale * jax.random.normal(k, shape)).astype(jnp.float32)

    dh = D // n_head
    qk_scale = 1.0 / (dh ** 0.5)

    # Linear weights pre-transposed to [in, out] and stored bf16 (MXU-native);
    # biases and LayerNorm params stay f32 (elementwise math stays f32).
    # Fold the 1/sqrt(dh) softmax scale into the Q third of wqkv / bqkv (f32
    # math, before the bf16 cast) so the kernel never scales score tiles.
    wqkv = nrm(ks[0], (n_layer, D, 3 * D))
    wqkv = wqkv.at[:, :, :D].multiply(qk_scale)
    bqkv = jnp.zeros((n_layer, 1, 3 * D), jnp.float32)
    bqkv = bqkv.at[:, :, :D].multiply(qk_scale)

    return {
        'wqkv': wqkv.astype(jnp.bfloat16),
        'bqkv': bqkv,
        'wo':   nrm(ks[1], (n_layer, D, D)).astype(jnp.bfloat16),
        'bo':   jnp.zeros((n_layer, 1, D), jnp.float32),
        'ln1w': jnp.ones((n_layer, 1, D), jnp.float32),
        'ln1b': jnp.zeros((n_layer, 1, D), jnp.float32),
        'w1':   nrm(ks[2], (n_layer, D, hidden)).astype(jnp.bfloat16),
        'b1':   nrm(ks[3], (n_layer, 1, hidden)),
        'w2':   nrm(ks[4], (n_layer, hidden, D)).astype(jnp.bfloat16),
        'b2':   nrm(ks[5], (n_layer, 1, D)),
        'ln2w': jnp.ones((n_layer, 1, D), jnp.float32),
        'ln2b': jnp.zeros((n_layer, 1, D), jnp.float32),
    }


if __name__ == "__main__":
    # Small shapes consistent with the module.  D and D//n_head are multiples
    # of 128 so every lane slice / store in the kernel is unmasked and
    # lane-dense (the single biggest measured lever on writeback-bound kernels).
    B, L, D = 2, 8, 256                 # batch, max_seq_len, embed_dim
    n_head, hidden, n_layer = 2, 512, 2  # nhead, dim_feedforward, num_layers
    eps = 1e-5
    n_items = 20

    key = jax.random.PRNGKey(0)
    k_item, k_pos, k_hist, k_params = jax.random.split(key, 4)

    # item_encoder ~ nn.Embedding(n_items, D, padding_idx=0)
    item_emb = (0.02 * jax.random.normal(k_item, (n_items, D))).astype(jnp.float32)
    item_emb = item_emb.at[0].set(0.0)
    # position_emb ~ nn.Embedding(max_seq_len, D)
    pos_emb = (0.02 * jax.random.normal(k_pos, (L, D))).astype(jnp.float32)
    params = init_params(k_params, n_layer, D, hidden, n_head)

    # batch: 'in_<fiid>' (right-padded item ids) and 'seqlen'
    seqlen = jnp.array([L, 5], dtype=jnp.int32)
    ids = jax.random.randint(k_hist, (B, L), 1, n_items, dtype=jnp.int32)
    user_hist = jnp.where(jnp.arange(L)[None, :] < seqlen[:, None], ids, 0)

    # ---- glue (matches the torch forward) --------------------------------
    seq_embs = item_emb[user_hist]                       # [B, L, D]
    position_embs = pos_emb[jnp.arange(L)][None, :, :]   # [1, L, D]
    x = (seq_embs + position_embs).astype(jnp.float32)   # transformer_input
    # self.dropout is identity in eval mode.

    # Only the tiny key-padding additive mask goes into the kernel; the causal
    # part is rebuilt in-kernel from iota (no [B, L, L] mask is materialized).
    pad_add = jnp.where(user_hist == 0, -1e30, 0.0).astype(jnp.float32)[:, None, :]

    # ---- Pallas transformer stack -----------------------------------------
    transformer_out = sasrec_transformer(x, pad_add, params,
                                         n_head=n_head, eps=eps)

    # eval pooling 'last': hidden state at position seqlen - 1
    gather_idx = jnp.broadcast_to((seqlen - 1)[:, None, None], (B, 1, D))
    query = jnp.take_along_axis(transformer_out, gather_idx, axis=1)[:, 0, :]

    jax.block_until_ready(query)
    assert query.shape == (B, D) and transformer_out.shape == (B, L, D)
    assert bool(jnp.all(jnp.isfinite(query)))
    print("KERNEL_OK")
</pallas_src>

<mosaic_0001>
module attributes {stable_mosaic.version = 11 : i64} {
  func.func @sasrec_layer_kernel(%arg0: i32, %arg1: i32, %arg2: memref<2x8x256xf32, #tpu.memory_space<vmem>>, %arg3: memref<2x1x8xf32, #tpu.memory_space<vmem>>, %arg4: memref<1x256x768xbf16, #tpu.memory_space<vmem>>, %arg5: memref<1x1x768xf32, #tpu.memory_space<vmem>>, %arg6: memref<1x256x256xbf16, #tpu.memory_space<vmem>>, %arg7: memref<1x1x256xf32, #tpu.memory_space<vmem>>, %arg8: memref<1x1x256xf32, #tpu.memory_space<vmem>>, %arg9: memref<1x1x256xf32, #tpu.memory_space<vmem>>, %arg10: memref<1x256x512xbf16, #tpu.memory_space<vmem>>, %arg11: memref<1x1x512xf32, #tpu.memory_space<vmem>>, %arg12: memref<1x512x256xbf16, #tpu.memory_space<vmem>>, %arg13: memref<1x1x256xf32, #tpu.memory_space<vmem>>, %arg14: memref<1x1x256xf32, #tpu.memory_space<vmem>>, %arg15: memref<1x1x256xf32, #tpu.memory_space<vmem>>, %arg16: memref<2x8x256xf32, #tpu.memory_space<vmem>>) attributes {dimension_semantics = [#tpu.dimension_semantics<parallel>, #tpu.dimension_semantics<arbitrary>], iteration_bounds = array<i64: 1, 2>, scalar_prefetch = 0 : i64, scratch_operands = 0 : i64, tpu.core_type = #tpu.core_type<tc>, window_params = [{transform_indices = @transform_0, window_bounds = array<i64: 2, 8, 256>}, {transform_indices = @transform_1, window_bounds = array<i64: 2, 1, 8>}, {transform_indices = @transform_2, window_bounds = array<i64: 1, 256, 768>}, {transform_indices = @transform_3, window_bounds = array<i64: 1, 1, 768>}, {transform_indices = @transform_4, window_bounds = array<i64: 1, 256, 256>}, {transform_indices = @transform_5, window_bounds = array<i64: 1, 1, 256>}, {transform_indices = @transform_6, window_bounds = array<i64: 1, 1, 256>}, {transform_indices = @transform_7, window_bounds = array<i64: 1, 1, 256>}, {transform_indices = @transform_8, window_bounds = array<i64: 1, 256, 512>}, {transform_indices = @transform_9, window_bounds = array<i64: 1, 1, 512>}, {transform_indices = @transform_10, window_bounds = array<i64: 1, 512, 256>}, {transform_indices = @transform_11, window_bounds = array<i64: 1, 1, 256>}, {transform_indices = @transform_12, window_bounds = array<i64: 1, 1, 256>}, {transform_indices = @transform_13, window_bounds = array<i64: 1, 1, 256>}, {transform_indices = @transform_14, window_bounds = array<i64: 2, 8, 256>}]} {
    %c0_i32 = arith.constant 0 : i32
    %0 = arith.cmpi eq, %arg1, %c0_i32 : i32
    %1 = arith.extui %0 : i1 to i32
    %c0_i32_0 = arith.constant 0 : i32
    %2 = arith.cmpi ne, %1, %c0_i32_0 : i32
    scf.if %2 {
      %c0_69 = arith.constant 0 : index
      %c0_70 = arith.constant 0 : index
      %c0_71 = arith.constant 0 : index
      %155 = vector.load %arg2[%c0_69, %c0_70, %c0_71] : memref<2x8x256xf32, #tpu.memory_space<vmem>>, vector<2x8x256xf32>
      %c0_72 = arith.constant 0 : index
      %c0_73 = arith.constant 0 : index
      %c0_74 = arith.constant 0 : index
      %156 = vector.load %arg16[%c0_72, %c0_73, %c0_74] : memref<2x8x256xf32, #tpu.memory_space<vmem>>, vector<2x8x256xf32>
      tpu.vector_store %arg16[%c0_72, %c0_73, %c0_74], %155 {strides = array<i32>} : memref<2x8x256xf32, #tpu.memory_space<vmem>>, vector<2x8x256xf32>,
    } else {
    }
    %c0 = arith.constant 0 : index
    %c0_1 = arith.constant 0 : index
    %c0_2 = arith.constant 0 : index
    %3 = vector.load %arg16[%c0, %c0_1, %c0_2] : memref<2x8x256xf32, #tpu.memory_space<vmem>>, vector<2x8x256xf32>
    %4 = vector.shape_cast %3 : vector<2x8x256xf32> to vector<16x256xf32>
    %5 = arith.truncf %4 : vector<16x256xf32> to vector<16x256xbf16>
    %c0_3 = arith.constant 0 : index
    %c0_4 = arith.constant 0 : index
    %c0_5 = arith.constant 0 : index
    %6 = vector.load %arg4[%c0_3, %c0_4, %c0_5] : memref<1x256x768xbf16, #tpu.memory_space<vmem>>, vector<1x256x768xbf16>
    %7 = vector.shape_cast %6 : vector<1x256x768xbf16> to vector<256x768xbf16>
    %cst = arith.constant dense<0.000000e+00> : vector<16x768xf32>
    %8 = tpu.matmul %5, %7, %cst {dimension_numbers = #tpu.dot_dimension_numbers<[1], [0], [0], [1], [0, 0, 1, 1], [], []>} : vector<16x256xbf16>, vector<256x768xbf16>, vector<16x768xf32> -> vector<16x768xf32>
    %c0_6 = arith.constant 0 : index
    %c0_7 = arith.constant 0 : index
    %c0_8 = arith.constant 0 : index
    %9 = vector.load %arg5[%c0_6, %c0_7, %c0_8] : memref<1x1x768xf32, #tpu.memory_space<vmem>>, vector<1x1x768xf32>
    %10 = vector.shape_cast %9 : vector<1x1x768xf32> to vector<1x768xf32>
    %11 = vector.broadcast %10 : vector<1x768xf32> to vector<16x768xf32>
    %12 = arith.addf %8, %11 : vector<16x768xf32>
    %13 = tpu.iota {dimensions = array<i32: 0>} : vector<8x8xi32>
    %14 = tpu.iota {dimensions = array<i32: 1>} : vector<8x8xi32>
    %15 = arith.cmpi sgt, %14, %13 : vector<8x8xi32>
    %cst_9 = arith.constant -1.000000e+30 : f32
    %cst_10 = arith.constant 0.000000e+00 : f32
    %16 = vector.broadcast %cst_9 : f32 to vector<8x8xf32>
    %17 = vector.broadcast %cst_10 : f32 to vector<8x8xf32>
    %18 = arith.select %15, %16, %17 : vector<8x8xi1>, vector<8x8xf32>
    %19 = vector.shape_cast %18 : vector<8x8xf32> to vector<1x8x8xf32>
    %c0_11 = arith.constant 0 : index
    %c0_12 = arith.constant 0 : index
    %c0_13 = arith.constant 0 : index
    %20 = vector.load %arg3[%c0_11, %c0_12, %c0_13] : memref<2x1x8xf32, #tpu.memory_space<vmem>>, vector<2x1x8xf32>
    %21 = vector.broadcast %19 : vector<1x8x8xf32> to vector<2x8x8xf32>
    %22 = vector.broadcast %20 : vector<2x1x8xf32> to vector<2x8x8xf32>
    %23 = arith.addf %21, %22 : vector<2x8x8xf32>
    %24 = vector.extract_strided_slice %12 {offsets = [0, 0], sizes = [16, 128], strides = [1, 1]} : vector<16x768xf32> to vector<16x128xf32>
    %25 = vector.extract_strided_slice %12 {offsets = [0, 256], sizes = [16, 128], strides = [1, 1]} : vector<16x768xf32> to vector<16x128xf32>
    %26 = vector.extract_strided_slice %12 {offsets = [0, 512], sizes = [16, 128], strides = [1, 1]} : vector<16x768xf32> to vector<16x128xf32>
    %27 = vector.shape_cast %24 : vector<16x128xf32> to vector<2x8x128xf32>
    %28 = arith.truncf %27 : vector<2x8x128xf32> to vector<2x8x128xbf16>
    %29 = vector.shape_cast %25 : vector<16x128xf32> to vector<2x8x128xf32>
    %30 = arith.truncf %29 : vector<2x8x128xf32> to vector<2x8x128xbf16>
    %31 = vector.shape_cast %26 : vector<16x128xf32> to vector<2x8x128xf32>
    %32 = arith.truncf %31 : vector<2x8x128xf32> to vector<2x8x128xbf16>
    "tpu.trace_start"() <{level = 10 : i32, message = "bqd,bkd->bqk"}> : () -> ()
    %cst_14 = arith.constant dense<0.000000e+00> : vector<2x8x8xf32>
    %33 = tpu.matmul %28, %30, %cst_14 {dimension_numbers = #tpu.dot_dimension_numbers<[2], [2], [1], [1], [0, 0, 0, 1, 1, 1], [0], [0]>} : vector<2x8x128xbf16>, vector<2x8x128xbf16>, vector<2x8x8xf32> -> vector<2x8x8xf32>
    "tpu.trace_stop"() : () -> ()
    %34 = arith.addf %33, %23 : vector<2x8x8xf32>
    %cst_15 = arith.constant dense<0xFF800000> : vector<2x8xf32>
    %35 = vector.multi_reduction <maximumf>, %34, %cst_15 [2] : vector<2x8x8xf32> to vector<2x8xf32>
    %36 = vector.shape_cast %35 : vector<2x8xf32> to vector<2x8x1xf32>
    %37 = vector.broadcast %36 : vector<2x8x1xf32> to vector<2x8x8xf32>
    %38 = arith.subf %34, %37 : vector<2x8x8xf32>
    %39 = math.exp %38 : vector<2x8x8xf32>
    %cst_16 = arith.constant dense<0.000000e+00> : vector<2x8xf32>
    %40 = vector.multi_reduction <add>, %39, %cst_16 [2] : vector<2x8x8xf32> to vector<2x8xf32>
    %41 = vector.shape_cast %40 : vector<2x8xf32> to vector<2x8x1xf32>
    %42 = tpu.reciprocal %41 {approx = true} : vector<2x8x1xf32> -> vector<2x8x1xf32>
    %43 = vector.broadcast %42 : vector<2x8x1xf32> to vector<2x8x8xf32>
    %44 = arith.mulf %39, %43 : vector<2x8x8xf32>
    %45 = arith.truncf %44 : vector<2x8x8xf32> to vector<2x8x8xbf16>
    "tpu.trace_start"() <{level = 10 : i32, message = "bqk,bkd->bqd"}> : () -> ()
    %cst_17 = arith.constant dense<0.000000e+00> : vector<2x8x128xf32>
    %46 = tpu.matmul %45, %32, %cst_17 {dimension_numbers = #tpu.dot_dimension_numbers<[2], [1], [1], [2], [0, 0, 0, 1, 1, 2], [0], [0]>} : vector<2x8x8xbf16>, vector<2x8x128xbf16>, vector<2x8x128xf32> -> vector<2x8x128xf32>
    "tpu.trace_stop"() : () -> ()
    %47 = arith.truncf %46 : vector<2x8x128xf32> to vector<2x8x128xbf16>
    %48 = vector.extract_strided_slice %12 {offsets = [0, 128], sizes = [16, 128], strides = [1, 1]} : vector<16x768xf32> to vector<16x128xf32>
    %49 = vector.extract_strided_slice %12 {offsets = [0, 384], sizes = [16, 128], strides = [1, 1]} : vector<16x768xf32> to vector<16x128xf32>
    %50 = vector.extract_strided_slice %12 {offsets = [0, 640], sizes = [16, 128], strides = [1, 1]} : vector<16x768xf32> to vector<16x128xf32>
    %51 = vector.shape_cast %48 : vector<16x128xf32> to vector<2x8x128xf32>
    %52 = arith.truncf %51 : vector<2x8x128xf32> to vector<2x8x128xbf16>
    %53 = vector.shape_cast %49 : vector<16x128xf32> to vector<2x8x128xf32>
    %54 = arith.truncf %53 : vector<2x8x128xf32> to vector<2x8x128xbf16>
    %55 = vector.shape_cast %50 : vector<16x128xf32> to vector<2x8x128xf32>
    %56 = arith.truncf %55 : vector<2x8x128xf32> to vector<2x8x128xbf16>
    "tpu.trace_start"() <{level = 10 : i32, message = "bqd,bkd->bqk"}> : () -> ()
    %cst_18 = arith.constant dense<0.000000e+00> : vector<2x8x8xf32>
    %57 = tpu.matmul %52, %54, %cst_18 {dimension_numbers = #tpu.dot_dimension_numbers<[2], [2], [1], [1], [0, 0, 0, 1, 1, 1], [0], [0]>} : vector<2x8x128xbf16>, vector<2x8x128xbf16>, vector<2x8x8xf32> -> vector<2x8x8xf32>
    "tpu.trace_stop"() : () -> ()
    %58 = arith.addf %57, %23 : vector<2x8x8xf32>
    %cst_19 = arith.constant dense<0xFF800000> : vector<2x8xf32>
    %59 = vector.multi_reduction <maximumf>, %58, %cst_19 [2] : vector<2x8x8xf32> to vector<2x8xf32>
    %60 = vector.shape_cast %59 : vector<2x8xf32> to vector<2x8x1xf32>
    %61 = vector.broadcast %60 : vector<2x8x1xf32> to vector<2x8x8xf32>
    %62 = arith.subf %58, %61 : vector<2x8x8xf32>
    %63 = math.exp %62 : vector<2x8x8xf32>
    %cst_20 = arith.constant dense<0.000000e+00> : vector<2x8xf32>
    %64 = vector.multi_reduction <add>, %63, %cst_20 [2] : vector<2x8x8xf32> to vector<2x8xf32>
    %65 = vector.shape_cast %64 : vector<2x8xf32> to vector<2x8x1xf32>
    %66 = tpu.reciprocal %65 {approx = true} : vector<2x8x1xf32> -> vector<2x8x1xf32>
    %67 = vector.broadcast %66 : vector<2x8x1xf32> to vector<2x8x8xf32>
    %68 = arith.mulf %63, %67 : vector<2x8x8xf32>
    %69 = arith.truncf %68 : vector<2x8x8xf32> to vector<2x8x8xbf16>
    "tpu.trace_start"() <{level = 10 : i32, message = "bqk,bkd->bqd"}> : () -> ()
    %cst_21 = arith.constant dense<0.000000e+00> : vector<2x8x128xf32>
    %70 = tpu.matmul %69, %56, %cst_21 {dimension_numbers = #tpu.dot_dimension_numbers<[2], [1], [1], [2], [0, 0, 0, 1, 1, 2], [0], [0]>} : vector<2x8x8xbf16>, vector<2x8x128xbf16>, vector<2x8x128xf32> -> vector<2x8x128xf32>
    "tpu.trace_stop"() : () -> ()
    %71 = arith.truncf %70 : vector<2x8x128xf32> to vector<2x8x128xbf16>
    %72 = tpu.concatenate %47, %71 in 2 : vector<2x8x128xbf16>, vector<2x8x128xbf16> -> vector<2x8x256xbf16>
    %73 = vector.shape_cast %72 : vector<2x8x256xbf16> to vector<16x256xbf16>
    %c0_22 = arith.constant 0 : index
    %c0_23 = arith.constant 0 : index
    %c0_24 = arith.constant 0 : index
    %74 = vector.load %arg6[%c0_22, %c0_23, %c0_24] : memref<1x256x256xbf16, #tpu.memory_space<vmem>>, vector<1x256x256xbf16>
    %75 = vector.shape_cast %74 : vector<1x256x256xbf16> to vector<256x256xbf16>
    %cst_25 = arith.constant dense<0.000000e+00> : vector<16x256xf32>
    %76 = tpu.matmul %73, %75, %cst_25 {dimension_numbers = #tpu.dot_dimension_numbers<[1], [0], [0], [1], [0, 0, 1, 1], [], []>} : vector<16x256xbf16>, vector<256x256xbf16>, vector<16x256xf32> -> vector<16x256xf32>
    %c0_26 = arith.constant 0 : index
    %c0_27 = arith.constant 0 : index
    %c0_28 = arith.constant 0 : index
    %77 = vector.load %arg7[%c0_26, %c0_27, %c0_28] : memref<1x1x256xf32, #tpu.memory_space<vmem>>, vector<1x1x256xf32>
    %78 = vector.shape_cast %77 : vector<1x1x256xf32> to vector<1x256xf32>
    %79 = vector.broadcast %78 : vector<1x256xf32> to vector<16x256xf32>
    %80 = arith.addf %76, %79 : vector<16x256xf32>
    %81 = arith.addf %4, %80 : vector<16x256xf32>
    %c0_29 = arith.constant 0 : index
    %c0_30 = arith.constant 0 : index
    %c0_31 = arith.constant 0 : index
    %82 = vector.load %arg8[%c0_29, %c0_30, %c0_31] : memref<1x1x256xf32, #tpu.memory_space<vmem>>, vector<1x1x256xf32>
    %83 = vector.shape_cast %82 : vector<1x1x256xf32> to vector<1x256xf32>
    %c0_32 = arith.constant 0 : index
    %c0_33 = arith.constant 0 : index
    %c0_34 = arith.constant 0 : index
    %84 = vector.load %arg9[%c0_32, %c0_33, %c0_34] : memref<1x1x256xf32, #tpu.memory_space<vmem>>, vector<1x1x256xf32>
    %85 = vector.shape_cast %84 : vector<1x1x256xf32> to vector<1x256xf32>
    %cst_35 = arith.constant dense<0.000000e+00> : vector<16xf32>
    %86 = vector.multi_reduction <add>, %81, %cst_35 [1] : vector<16x256xf32> to vector<16xf32>
    %87 = vector.shape_cast %86 : vector<16xf32> to vector<16x1xf32>
    %cst_36 = arith.constant 2.560000e+02 : f32
    %88 = vector.broadcast %cst_36 : f32 to vector<16x1xf32>
    %89 = arith.divf %87, %88 : vector<16x1xf32>
    %90 = vector.broadcast %89 : vector<16x1xf32> to vector<16x256xf32>
    %91 = arith.subf %81, %90 : vector<16x256xf32>
    %92 = arith.mulf %91, %91 : vector<16x256xf32>
    %cst_37 = arith.constant dense<0.000000e+00> : vector<16xf32>
    %93 = vector.multi_reduction <add>, %92, %cst_37 [1] : vector<16x256xf32> to vector<16xf32>
    %94 = vector.shape_cast %93 : vector<16xf32> to vector<16x1xf32>
    %cst_38 = arith.constant 2.560000e+02 : f32
    %95 = vector.broadcast %cst_38 : f32 to vector<16x1xf32>
    %96 = arith.divf %94, %95 : vector<16x1xf32>
    %97 = vector.broadcast %89 : vector<16x1xf32> to vector<16x256xf32>
    %98 = arith.subf %81, %97 : vector<16x256xf32>
    %cst_39 = arith.constant 9.99999974E-6 : f32
    %99 = vector.broadcast %cst_39 : f32 to vector<16x1xf32>
    %100 = arith.addf %96, %99 : vector<16x1xf32>
    %101 = math.rsqrt %100 : vector<16x1xf32>
    %102 = vector.broadcast %101 : vector<16x1xf32> to vector<16x256xf32>
    %103 = arith.mulf %98, %102 : vector<16x256xf32>
    %104 = vector.broadcast %83 : vector<1x256xf32> to vector<16x256xf32>
    %105 = arith.mulf %103, %104 : vector<16x256xf32>
    %106 = vector.broadcast %85 : vector<1x256xf32> to vector<16x256xf32>
    %107 = arith.addf %105, %106 : vector<16x256xf32>
    %108 = arith.truncf %107 : vector<16x256xf32> to vector<16x256xbf16>
    %c0_40 = arith.constant 0 : index
    %c0_41 = arith.constant 0 : index
    %c0_42 = arith.constant 0 : index
    %109 = vector.load %arg10[%c0_40, %c0_41, %c0_42] : memref<1x256x512xbf16, #tpu.memory_space<vmem>>, vector<1x256x512xbf16>
    %110 = vector.shape_cast %109 : vector<1x256x512xbf16> to vector<256x512xbf16>
    %cst_43 = arith.constant dense<0.000000e+00> : vector<16x512xf32>
    %111 = tpu.matmul %108, %110, %cst_43 {dimension_numbers = #tpu.dot_dimension_numbers<[1], [0], [0], [1], [0, 0, 1, 1], [], []>} : vector<16x256xbf16>, vector<256x512xbf16>, vector<16x512xf32> -> vector<16x512xf32>
    %c0_44 = arith.constant 0 : index
    %c0_45 = arith.constant 0 : index
    %c0_46 = arith.constant 0 : index
    %112 = vector.load %arg11[%c0_44, %c0_45, %c0_46] : memref<1x1x512xf32, #tpu.memory_space<vmem>>, vector<1x1x512xf32>
    %113 = vector.shape_cast %112 : vector<1x1x512xf32> to vector<1x512xf32>
    %114 = vector.broadcast %113 : vector<1x512xf32> to vector<16x512xf32>
    %115 = arith.addf %111, %114 : vector<16x512xf32>
    %cst_47 = arith.constant 0.000000e+00 : f32
    %116 = vector.broadcast %cst_47 : f32 to vector<16x512xf32>
    %117 = arith.maximumf %115, %116 : vector<16x512xf32>
    %118 = arith.truncf %117 : vector<16x512xf32> to vector<16x512xbf16>
    %c0_48 = arith.constant 0 : index
    %c0_49 = arith.constant 0 : index
    %c0_50 = arith.constant 0 : index
    %119 = vector.load %arg12[%c0_48, %c0_49, %c0_50] : memref<1x512x256xbf16, #tpu.memory_space<vmem>>, vector<1x512x256xbf16>
    %120 = vector.shape_cast %119 : vector<1x512x256xbf16> to vector<512x256xbf16>
    %cst_51 = arith.constant dense<0.000000e+00> : vector<16x256xf32>
    %121 = tpu.matmul %118, %120, %cst_51 {dimension_numbers = #tpu.dot_dimension_numbers<[1], [0], [0], [1], [0, 0, 1, 1], [], []>} : vector<16x512xbf16>, vector<512x256xbf16>, vector<16x256xf32> -> vector<16x256xf32>
    %c0_52 = arith.constant 0 : index
    %c0_53 = arith.constant 0 : index
    %c0_54 = arith.constant 0 : index
    %122 = vector.load %arg13[%c0_52, %c0_53, %c0_54] : memref<1x1x256xf32, #tpu.memory_space<vmem>>, vector<1x1x256xf32>
    %123 = vector.shape_cast %122 : vector<1x1x256xf32> to vector<1x256xf32>
    %124 = vector.broadcast %123 : vector<1x256xf32> to vector<16x256xf32>
    %125 = arith.addf %121, %124 : vector<16x256xf32>
    %126 = arith.addf %107, %125 : vector<16x256xf32>
    %c0_55 = arith.constant 0 : index
    %c0_56 = arith.constant 0 : index
    %c0_57 = arith.constant 0 : index
    %127 = vector.load %arg14[%c0_55, %c0_56, %c0_57] : memref<1x1x256xf32, #tpu.memory_space<vmem>>, vector<1x1x256xf32>
    %128 = vector.shape_cast %127 : vector<1x1x256xf32> to vector<1x256xf32>
    %c0_58 = arith.constant 0 : index
    %c0_59 = arith.constant 0 : index
    %c0_60 = arith.constant 0 : index
    %129 = vector.load %arg15[%c0_58, %c0_59, %c0_60] : memref<1x1x256xf32, #tpu.memory_space<vmem>>, vector<1x1x256xf32>
    %130 = vector.shape_cast %129 : vector<1x1x256xf32> to vector<1x256xf32>
    %cst_61 = arith.constant dense<0.000000e+00> : vector<16xf32>
    %131 = vector.multi_reduction <add>, %126, %cst_61 [1] : vector<16x256xf32> to vector<16xf32>
    %132 = vector.shape_cast %131 : vector<16xf32> to vector<16x1xf32>
    %cst_62 = arith.constant 2.560000e+02 : f32
    %133 = vector.broadcast %cst_62 : f32 to vector<16x1xf32>
    %134 = arith.divf %132, %133 : vector<16x1xf32>
    %135 = vector.broadcast %134 : vector<16x1xf32> to vector<16x256xf32>
    %136 = arith.subf %126, %135 : vector<16x256xf32>
    %137 = arith.mulf %136, %136 : vector<16x256xf32>
    %cst_63 = arith.constant dense<0.000000e+00> : vector<16xf32>
    %138 = vector.multi_reduction <add>, %137, %cst_63 [1] : vector<16x256xf32> to vector<16xf32>
    %139 = vector.shape_cast %138 : vector<16xf32> to vector<16x1xf32>
    %cst_64 = arith.constant 2.560000e+02 : f32
    %140 = vector.broadcast %cst_64 : f32 to vector<16x1xf32>
    %141 = arith.divf %139, %140 : vector<16x1xf32>
    %142 = vector.broadcast %134 : vector<16x1xf32> to vector<16x256xf32>
    %143 = arith.subf %126, %142 : vector<16x256xf32>
    %cst_65 = arith.constant 9.99999974E-6 : f32
    %144 = vector.broadcast %cst_65 : f32 to vector<16x1xf32>
    %145 = arith.addf %141, %144 : vector<16x1xf32>
    %146 = math.rsqrt %145 : vector<16x1xf32>
    %147 = vector.broadcast %146 : vector<16x1xf32> to vector<16x256xf32>
    %148 = arith.mulf %143, %147 : vector<16x256xf32>
    %149 = vector.broadcast %128 : vector<1x256xf32> to vector<16x256xf32>
    %150 = arith.mulf %148, %149 : vector<16x256xf32>
    %151 = vector.broadcast %130 : vector<1x256xf32> to vector<16x256xf32>
    %152 = arith.addf %150, %151 : vector<16x256xf32>
    %153 = vector.shape_cast %152 : vector<16x256xf32> to vector<2x8x256xf32>
    %c0_66 = arith.constant 0 : index
    %c0_67 = arith.constant 0 : index
    %c0_68 = arith.constant 0 : index
    %154 = vector.load %arg16[%c0_66, %c0_67, %c0_68] : memref<2x8x256xf32, #tpu.memory_space<vmem>>, vector<2x8x256xf32>
    tpu.vector_store %arg16[%c0_66, %c0_67, %c0_68], %153 {strides = array<i32>} : memref<2x8x256xf32, #tpu.memory_space<vmem>>, vector<2x8x256xf32>,
    return
  }
  func.func @transform_0(%arg0: i32, %arg1: i32) -> (i32, i32, i32) {
    %c0_i32 = arith.constant 0 : i32
    %c0_i32_0 = arith.constant 0 : i32
    %c0_i32_1 = arith.constant 0 : i32
    return %arg0, %c0_i32, %c0_i32_0 : i32, i32, i32
  }
  func.func @transform_1(%arg0: i32, %arg1: i32) -> (i32, i32, i32) {
    %c0_i32 = arith.constant 0 : i32
    %c0_i32_0 = arith.constant 0 : i32
    %c0_i32_1 = arith.constant 0 : i32
    return %arg0, %c0_i32, %c0_i32_0 : i32, i32, i32
  }
  func.func @transform_2(%arg0: i32, %arg1: i32) -> (i32, i32, i32) {
    %c0_i32 = arith.constant 0 : i32
    %c0_i32_0 = arith.constant 0 : i32
    %c0_i32_1 = arith.constant 0 : i32
    return %arg1, %c0_i32, %c0_i32_0 : i32, i32, i32
  }
  func.func @transform_3(%arg0: i32, %arg1: i32) -> (i32, i32, i32) {
    %c0_i32 = arith.constant 0 : i32
    %c0_i32_0 = arith.constant 0 : i32
    %c0_i32_1 = arith.constant 0 : i32
    return %arg1, %c0_i32, %c0_i32_0 : i32, i32, i32
  }
  func.func @transform_4(%arg0: i32, %arg1: i32) -> (i32, i32, i32) {
    %c0_i32 = arith.constant 0 : i32
    %c0_i32_0 = arith.constant 0 : i32
    %c0_i32_1 = arith.constant 0 : i32
    return %arg1, %c0_i32, %c0_i32_0 : i32, i32, i32
  }
  func.func @transform_5(%arg0: i32, %arg1: i32) -> (i32, i32, i32) {
    %c0_i32 = arith.constant 0 : i32
    %c0_i32_0 = arith.constant 0 : i32
    %c0_i32_1 = arith.constant 0 : i32
    return %arg1, %c0_i32, %c0_i32_0 : i32, i32, i32
  }
  func.func @transform_6(%arg0: i32, %arg1: i32) -> (i32, i32, i32) {
    %c0_i32 = arith.constant 0 : i32
    %c0_i32_0 = arith.constant 0 : i32
    %c0_i32_1 = arith.constant 0 : i32
    return %arg1, %c0_i32, %c0_i32_0 : i32, i32, i32
  }
  func.func @transform_7(%arg0: i32, %arg1: i32) -> (i32, i32, i32) {
    %c0_i32 = arith.constant 0 : i32
    %c0_i32_0 = arith.constant 0 : i32
    %c0_i32_1 = arith.constant 0 : i32
    return %arg1, %c0_i32, %c0_i32_0 : i32, i32, i32
  }
  func.func @transform_8(%arg0: i32, %arg1: i32) -> (i32, i32, i32) {
    %c0_i32 = arith.constant 0 : i32
    %c0_i32_0 = arith.constant 0 : i32
    %c0_i32_1 = arith.constant 0 : i32
    return %arg1, %c0_i32, %c0_i32_0 : i32, i32, i32
  }
  func.func @transform_9(%arg0: i32, %arg1: i32) -> (i32, i32, i32) {
    %c0_i32 = arith.constant 0 : i32
    %c0_i32_0 = arith.constant 0 : i32
    %c0_i32_1 = arith.constant 0 : i32
    return %arg1, %c0_i32, %c0_i32_0 : i32, i32, i32
  }
  func.func @transform_10(%arg0: i32, %arg1: i32) -> (i32, i32, i32) {
    %c0_i32 = arith.constant 0 : i32
    %c0_i32_0 = arith.constant 0 : i32
    %c0_i32_1 = arith.constant 0 : i32
    return %arg1, %c0_i32, %c0_i32_0 : i32, i32, i32
  }
  func.func @transform_11(%arg0: i32, %arg1: i32) -> (i32, i32, i32) {
    %c0_i32 = arith.constant 0 : i32
    %c0_i32_0 = arith.constant 0 : i32
    %c0_i32_1 = arith.constant 0 : i32
    return %arg1, %c0_i32, %c0_i32_0 : i32, i32, i32
  }
  func.func @transform_12(%arg0: i32, %arg1: i32) -> (i32, i32, i32) {
    %c0_i32 = arith.constant 0 : i32
    %c0_i32_0 = arith.constant 0 : i32
    %c0_i32_1 = arith.constant 0 : i32
    return %arg1, %c0_i32, %c0_i32_0 : i32, i32, i32
  }
  func.func @transform_13(%arg0: i32, %arg1: i32) -> (i32, i32, i32) {
    %c0_i32 = arith.constant 0 : i32
    %c0_i32_0 = arith.constant 0 : i32
    %c0_i32_1 = arith.constant 0 : i32
    return %arg1, %c0_i32, %c0_i32_0 : i32, i32, i32
  }
  func.func @transform_14(%arg0: i32, %arg1: i32) -> (i32, i32, i32) {
    %c0_i32 = arith.constant 0 : i32
    %c0_i32_0 = arith.constant 0 : i32
    %c0_i32_1 = arith.constant 0 : i32
    return %arg0, %c0_i32, %c0_i32_0 : i32, i32, i32
  }
}

</mosaic_0001>

<bundles_post_ra>
// kernel: tpu_custom_call.1
= control target key start
LH: loop header
LB: loop body
LE: loop exit
PB: predicated region body
PF: predicated region fallthrough
CT: control target
= control target key end

     0   :  { %s6376_s0 = inlined_call_operand.hbm [shape: f32[2,8,256], index: 0, kind: input, shape index: {}]   ;;  %s6377_s1 = inlined_call_operand.hbm [shape: f32[2,1,8], index: 1, kind: input, shape index: {}]   ;;  %s6378_s2 = inlined_call_operand.hbm [shape: bf16[2,256,768], index: 2, kind: input, shape index: {}]   ;;  %s6379_s3 = inlined_call_operand.hbm [shape: f32[2,1,768], index: 3, kind: input, shape index: {}]   ;;  %s6380_s4 = inlined_call_operand.hbm [shape: bf16[2,256,256], index: 4, kind: input, shape index: {}]   ;;  %s6381_s5 = inlined_call_operand.hbm [shape: f32[2,1,256], index: 5, kind: input, shape index: {}]   ;;  %s6382_s6 = inlined_call_operand.hbm [shape: f32[2,1,256], index: 6, kind: input, shape index: {}]   ;;  %s6383_s7 = inlined_call_operand.hbm [shape: f32[2,1,256], index: 7, kind: input, shape index: {}]   ;;  %s6384_s8 = inlined_call_operand.hbm [shape: bf16[2,256,512], index: 8, kind: input, shape index: {}]   ;;  %s6385_s9 = inlined_call_operand.hbm [shape: f32[2,1,512], index: 9, kind: input, shape index: {}]   ;;  %s6386_s10 = inlined_call_operand.hbm [shape: bf16[2,512,256], index: 10, kind: input, shape index: {}]   ;;  %s6387_s11 = inlined_call_operand.hbm [shape: f32[2,1,256], index: 11, kind: input, shape index: {}]   ;;  %s6388_s12 = inlined_call_operand.hbm [shape: f32[2,1,256], index: 12, kind: input, shape index: {}]   ;;  %s6389_s13 = inlined_call_operand.hbm [shape: f32[2,1,256], index: 13, kind: input, shape index: {}]   ;;  %s6390_s14 = inlined_call_operand.hbm [shape: f32[2,8,256], index: 14, kind: output, shape index: {}]  }
   0x1   :  { %6424 = sst [smem:[#allocation34_spill]] %s6376_s0 }
   0x2   :  { %6425 = sst [smem:[#allocation35_spill]] %s6377_s1 }
   0x3   :  { %6426 = sst [smem:[#allocation36_spill]] %s6378_s2 }
   0x4   :  { %6427 = sst [smem:[#allocation37_spill]] %s6379_s3 }
   0x5   :  { %6428 = sst [smem:[#allocation38_spill]] %s6389_s13 }
   0x6   :  { %6429 = sst [smem:[#allocation39_spill]] %s6390_s14 }
   0x7   :  { %19 = vsyncpa [#allocation3], 0 }
   0x8   :  { %20 = vsyncpa [#allocation6], 0 }
   0x9   :  { %21 = vsyncpa [#allocation4], 0  ;;  %s5399_s29 = smov 0   ;;  %s5401_s30 = smov 0  }
   0xa   :  { %s5403_s15 = smov 0   ;;  %s5405_s16 = smov 0  }
   0xb   :  { %s5407_s17 = smov 0   ;;  %s5409_s18 = smov 0  }
   0xc LB: > { %6430 = sst [smem:[#allocation24_spill]] %s5280_s30  ;;  %s5428_s19 = sadd.s32 4294967295, %s5296_s18   ;;  %s5296_s18 = sphi %s5409_s18, %s27_s18   ;;  %s5292_s17 = sphi %s5407_s17, %s6491_s17   ;;  %s5288_s16 = sphi %s5405_s16, %s6490_s16   ;;  %s5284_s15 = sphi %s5403_s15, %s6488_s15   ;;  %s5280_s30 = sphi %s5401_s30, %s6487_s30   ;;  %s5276_s29 = sphi %s5399_s29, %s6486_s29  }
   0xd   : > { %6431 = sst [smem:[#allocation25_spill]] %s5284_s15  ;;  %s36_s20 = sadd.s32 1, %s5292_s17 }
   0xe   : > { %6432 = sst [smem:[#allocation26_spill]] %s5288_s16  ;;  %p37_p0 = scmp.ge.s32.totalorder %s36_s20, 2 }
   0xf   : > { %6433 = sst [smem:[#allocation27_spill]] %s5296_s18  ;;  %s98_s21 = sadd.s32 1, %s5284_s15 }
  0x10   : > { %6434 = sst [smem:[#allocation28_spill]] %s5428_s19  ;;  %p105_p1 = scmp.ne.s32.totalorder %s5284_s15, %s5280_s30 }
  0x11   : > { %p106_p2 = scmp.eq.s32.totalorder %s5296_s18, 0  ;;  %s6493_s20 = smov (%p37_p0, %s36_s20), 0 }
  0x12   : > { %6435 = sst [smem:[#allocation29_spill]] %s6493_s20  ;;  %p111_p4 = scmp.ne.s32.totalorder %s5280_s30, %s5276_s29 }
  0x13   : > { %p5437_p3 = por %p106_p2, %p105_p1  ;;  %s95_s23 = ssub.s32 %s5292_s17, %s6493_s20 }
  0x14   : > { %p6395_p5 = scmp.eq.s32.totalorder %s5428_s19, 0  ;;  %p96_p6 = scmp.eq.s32.totalorder %s95_s23, 0 }
  0x15   : > { %s6436_s22 = scalar_select %p5437_p3, 1, 0 }
  0x16   : > { %p3823_p7 = scmp.ge.s32.totalorder %s5296_s18, 1  ;;  %p5448_p8 = por %p6395_p5, %p111_p4 }
  0x17   : > { %p434_p9 = scmp.lt.s32.totalorder %s5296_s18, 3  ;;  %s5298_s27 = smov [#allocation2]  }
  0x18   : > { %s6437_s24 = scalar_select %p5448_p8, 1, 0 }
  0x19   : > { %s5454_s25 = scalar_select %p96_p6, %s5284_s15, %s98_s21  }
  0x1a   : > { %6438 = sst [smem:[#allocation30_spill]] %s6437_s24  ;;  %p5456_p10 = pnand %p3823_p7, %p434_p9 }
  0x1b   : > { %6439 = sst [smem:[#allocation31_spill]] %s5454_s25  ;;  %s450_s28 = sshll.u32 %s5298_s27, 4  ;;  %s451_s28 = int_to_ptr.vmem [resolvable:$true] %s450_s28 }
  0x1c   : > { %s6440_s26 = scalar_select %p5456_p10, 1, 0 }
  0x1d   : > { %p4267_p11 = pneg %p5456_p10  ;;  %s6444_s0 = sld [smem:[#allocation34_spill]] }
  0x1e   : > { %6441 = sst [smem:[#allocation32_spill]] %s6440_s26 }
  0x1f   : > { %p5464_p12 = pnand %p4267_p11, %p6395_p5 }
  0x21   : > { %s6442_s29 = scalar_select %p5464_p12, 1, 0 }
  0x22   : > { %p6406_p1 = pneg %p5464_p12 }
  0x23   : > { %6443 = sst [smem:[#allocation33_spill]] %s6442_s29  ;;  %s4792_s25 = scalar_lea.hbm %s6444_s0, 512 }
  0x24   : > { %p4793_p0 = scmp.ne.s32.totalorder %s6444_s0, %s4792_s25  ;;  %p4799_p6 = scmp.lt.u32.totalorder %s4792_s25, %s6444_s0 }
  0x26   : > { %p4795_p2 = pnand %p6406_p1, %p4793_p0 }
  0x28   : > { %p4796_p4 = pneg %p4795_p2 }
  0x2a   : > { %p4801_p7 = pnand %p4799_p6, %p4796_p4 }
  0x2c   : > { %4804 = shalt.err (!%p4801_p7)
}
  0x2d   : > { %s4805_s21 = scalar_lea.vmem %s451_s28, 512  ;;  %p4813_p13 = scmp.lt.s32.totalorder %s451_s28, %s451_s28 }
  0x2e   : > { %p4806_p9 = scmp.ne.s32.totalorder %s451_s28, %s4805_s21  ;;  %p4814_p8 = scmp.lt.s32.totalorder %s4805_s21, %s4805_s21 }
  0x30   : > { %p4808_p11 = pnand %p4806_p9, %p6406_p1  ;;  %p4815_p10 = por %p4814_p8, %p4813_p13 }
  0x32   : > { %p4809_p5 = pneg %p4808_p11 }
  0x34   : > { %p4816_p3 = pnand %p4815_p10, %p4809_p5 }
  0x36   : > { %4819 = shalt.err (!%p4816_p3)
}
  0x37   : > { %s6403_s14 = smov 256   ;;  %s6404_s16 = smov 16  }
  0x38   : > { %4270 = dma.hbm_to_vmem [thread:$0]  (!%p5464_p12), %s6444_s0, 512, %s451_s28, [#allocation3], %s6403_s14, %s6403_s14, %s6404_s16  }
  0x39   : > { %p6445_p0 = scmp.ne.s32.totalorder %s6436_s22, 0  ;;  %p6446_p8 = scmp.lt.s32.totalorder %s5296_s18, 2 }
  0x3a   : > { %s5504_s21 = sand.u32 1, %s5284_s15   ;;  %s4226_s27 = smul.u32 12288, %s5292_s17 }
  0x3b   : > { %p5499_p5 = pnand %p6446_p8, %p6445_p0  ;;  %s4225_s23 = smul.u32 768, %s5504_s21 }
  0x3c   : > { %s6448_s2 = sld [smem:[#allocation36_spill]]  ;;  %s4227_s20 = smul.u32 6, %s5504_s21 }
  0x3d   : > { %s6447_s25 = scalar_select %p5499_p5, 1, 0 }
  0x3e   : > { %s484_s22 = scalar_lea.vmem [#allocation7], %s4225_s23  ;;  %s6449_s24 = sand.u32 1, %s5296_s18  }
  0x3f   : > { %s491_s28 = sshll.u32 %s484_s22, 4  ;;  %s5518_s14 = scalar_lea.sflag [#allocation3], %s6449_s24  ;;  %s5513_s28 = int_to_ptr.vmem [resolvable:$true] %s491_s28 }
  0x40   : > { %p5524_p10 = pneg %p5499_p5 }
  0x42   : > { %s5511_s26 = scalar_lea.hbm %s6448_s2, %s4226_s27  ;;  %s4825_s23 = scalar_lea.hbm %s6448_s2, 24576 }
  0x43   : > { %s4820_s16 = scalar_lea.hbm %s5511_s26, 12288  ;;  %p4826_p4 = scmp.lt.u32.totalorder %s5511_s26, %s6448_s2 }
  0x44   : > { %p4821_p3 = scmp.ne.s32.totalorder %s5511_s26, %s4820_s16  ;;  %p4827_p6 = scmp.lt.u32.totalorder %s4825_s23, %s4820_s16 }
  0x45   : > { %s6450_s0 = scalar_select %p5524_p10, 1, 0 }
  0x46   : > { %p4823_p13 = pnand %p5524_p10, %p4821_p3  ;;  %p4828_p7 = por %p4827_p6, %p4826_p4 }
  0x47   : > { %p4829_p9 = scmp.lt.u32.totalorder %s4820_s16, %s5511_s26 }
  0x48   : > { %p4824_p2 = pneg %p4823_p13 }
  0x49   : > { %p4830_p11 = por %p4829_p9, %p4828_p7 }
  0x4b   : > { %p4831_p0 = pnand %p4830_p11, %p4824_p2 }
  0x4d   : > { %4834 = shalt.err (!%p4831_p0)
}
  0x4e   : > { %s4835_s24 = scalar_lea.vmem %s5513_s28, 12288  ;;  %s5301_s30 = smov [#allocation7]  }
  0x4f   : > { %p4836_p8 = scmp.ne.s32.totalorder %s5513_s28, %s4835_s24  ;;  %s4840_s19 = sshll.u32 %s5301_s30, 4  ;;  %s4841_s19 = int_to_ptr.vmem [resolvable:$false] %s4840_s19 }
  0x50   : > { %s4842_s27 = scalar_lea.vmem %s4841_s19, 24576  ;;  %p4843_p1 = scmp.lt.s32.totalorder %s5513_s28, %s4841_s19 }
  0x51   : > { %p4838_p3 = pnand %p4836_p8, %p5524_p10  ;;  %p4844_p12 = scmp.lt.s32.totalorder %s4842_s27, %s4835_s24 }
  0x53   : > { %p4839_p13 = pneg %p4838_p3  ;;  %p4845_p4 = por %p4844_p12, %p4843_p1 }
  0x55   : > { %p4846_p6 = pnand %p4845_p4, %p4839_p13 }
  0x57   : > { %4849 = shalt.err (!%p4846_p6)
}
  0x58   : > { %s5302_s16 = smov 384   ;;  %s5303_s23 = smov 24  }
  0x59   : > { %4277 = dma.hbm_to_vmem [thread:$0]  (!%p5499_p5), %s5511_s26, 12288, %s5513_s28, %s5518_s14, %s5302_s16, %s5302_s16, %s5303_s23  }
  0x5a   : > { %s4228_s22 = smul.u32 96, %s5292_s17  ;;  %s505_s30 = scalar_lea.vmem [#allocation8], %s4227_s20 }
  0x5b   : > { %s513_s19 = sshll.u32 %s505_s30, 4  ;;  %s3829_s24 = sshll.u32 %s5504_s21, 8  ;;  %s514_s19 = int_to_ptr.vmem [resolvable:$true] %s513_s19 }
  0x5c   : > { %s6451_s3 = sld [smem:[#allocation37_spill]] }
  0x62   : > { %s511_s15 = scalar_lea.hbm %s6451_s3, %s4228_s22  ;;  %s4855_s29 = scalar_lea.hbm %s6451_s3, 192 }
  0x63   : > { %s4850_s18 = scalar_lea.hbm %s511_s15, 96  ;;  %p4856_p7 = scmp.lt.u32.totalorder %s511_s15, %s6451_s3 }
  0x64   : > { %p4851_p12 = scmp.ne.s32.totalorder %s511_s15, %s4850_s18  ;;  %p4857_p9 = scmp.lt.u32.totalorder %s4855_s29, %s4850_s18 }
  0x65   : > { %p4859_p0 = scmp.lt.u32.totalorder %s4850_s18, %s511_s15 }
  0x66   : > { %p4853_p1 = pnand %p4851_p12, %p5524_p10  ;;  %p4858_p11 = por %p4857_p9, %p4856_p7 }
  0x68   : > { %p4854_p2 = pneg %p4853_p1  ;;  %p4860_p8 = por %p4859_p0, %p4858_p11 }
  0x6a   : > { %p4861_p3 = pnand %p4860_p8, %p4854_p2 }
  0x6c   : > { %4864 = shalt.err (!%p4861_p3)
}
  0x6d   : > { %s4865_s2 = scalar_lea.vmem %s514_s19, 96  ;;  %s5304_s20 = smov [#allocation8]  }
  0x6e   : > { %p4866_p13 = scmp.ne.s32.totalorder %s514_s19, %s4865_s2  ;;  %s4870_s16 = sshll.u32 %s5304_s20, 4  ;;  %s4871_s16 = int_to_ptr.vmem [resolvable:$false] %s4870_s16 }
  0x6f   : > { %s4872_s1 = scalar_lea.vmem %s4871_s16, 192  ;;  %p4873_p12 = scmp.lt.s32.totalorder %s514_s19, %s4871_s16 }
  0x70   : > { %p4868_p4 = pnand %p4866_p13, %p5524_p10  ;;  %p4874_p1 = scmp.lt.s32.totalorder %s4872_s1, %s4865_s2 }
  0x72   : > { %p4869_p6 = pneg %p4868_p4  ;;  %p4875_p5 = por %p4874_p1, %p4873_p12 }
  0x74   : > { %p4876_p7 = pnand %p4875_p5, %p4869_p6 }
  0x76   : > { %4879 = shalt.err (!%p4876_p7)
}
  0x77   : > { %p6452_p9 = scmp.ne.s32.totalorder %s6447_s25, 0  ;;  %s4141_s13 = sshll.u32 %s5292_s17, 12 }
  0x78   : > { %s5572_s23 = scalar_lea.hbm %s6380_s4, %s4141_s13  ;;  %s524_s22 = scalar_lea.vmem [#allocation9], %s3829_s24 }
  0x79   : > { %4280 = dma.hbm_to_vmem [thread:$0]  (!%p6452_p9), %s511_s15, 96, %s514_s19, %s5518_s14  }
  0x7a   : > { %s531_s30 = sshll.u32 %s524_s22, 4  ;;  %s5579_s27 = sshll.u32 %s5504_s21, 1  ;;  %s5576_s30 = int_to_ptr.vmem [resolvable:$true] %s531_s30 }
  0x7b   : > { %s4880_s26 = scalar_lea.hbm %s5572_s23, 4096  ;;  %s4885_s28 = scalar_lea.hbm %s6380_s4, 8192 }
  0x7c   : > { %p4881_p5 = scmp.ne.s32.totalorder %s5572_s23, %s4880_s26  ;;  %p4886_p0 = scmp.lt.u32.totalorder %s5572_s23, %s6380_s4 }
  0x7d   : > { %p4887_p8 = scmp.lt.u32.totalorder %s4885_s28, %s4880_s26  ;;  %p4889_p13 = scmp.lt.u32.totalorder %s4880_s26, %s5572_s23 }
  0x7e   : > { %p4883_p2 = pnand %p4881_p5, %p5524_p10 }
  0x7f   : > { %p4888_p3 = por %p4887_p8, %p4886_p0 }
  0x80   : > { %p4884_p11 = pneg %p4883_p2 }
  0x81   : > { %p4890_p4 = por %p4889_p13, %p4888_p3 }
  0x83   : > { %p4891_p6 = pnand %p4890_p4, %p4884_p11 }
  0x85   : > { %4894 = shalt.err (!%p4891_p6)
}
  0x86   : > { %s4895_s24 = scalar_lea.vmem %s5576_s30, 4096  ;;  %s5305_s16 = smov [#allocation9]  }
  0x87   : > { %p4896_p12 = scmp.ne.s32.totalorder %s5576_s30, %s4895_s24  ;;  %s4900_s1 = sshll.u32 %s5305_s16, 4  ;;  %s4901_s1 = int_to_ptr.vmem [resolvable:$false] %s4900_s1 }
  0x88   : > { %s4902_s13 = scalar_lea.vmem %s4901_s1, 8192  ;;  %p4903_p5 = scmp.lt.s32.totalorder %s5576_s30, %s4901_s1 }
  0x89   : > { %p4898_p1 = pnand %p4896_p12, %p5524_p10  ;;  %p4904_p2 = scmp.lt.s32.totalorder %s4902_s13, %s4895_s24 }
  0x8b   : > { %p4899_p7 = pneg %p4898_p1  ;;  %p4905_p0 = por %p4904_p2, %p4903_p5 }
  0x8d   : > { %p4906_p8 = pnand %p4905_p0, %p4899_p7 }
  0x8f   : > { %4909 = shalt.err (!%p4906_p8)
}
  0x90   : > { %s6418_s18 = smov 128   ;;  %s6419_s29 = smov 8  }
  0x91   : > { %4283 = dma.hbm_to_vmem [thread:$0]  (!%p6452_p9), %s5572_s23, 4096, %s5576_s30, %s5518_s14, %s6418_s18, %s6418_s18, %s6419_s29  }
  0x92   : > { %s5607_s22 = sshll.u32 %s5292_s17, 5  ;;  %s545_s28 = scalar_lea.vmem [#allocation10], %s5579_s27 }
  0x93   : > { %s5613_s19 = scalar_lea.hbm %s6381_s5, %s5607_s22  ;;  %s553_s2 = sshll.u32 %s545_s28, 4  ;;  %s554_s2 = int_to_ptr.vmem [resolvable:$true] %s553_s2 }
  0x94   : > { %s4910_s20 = scalar_lea.hbm %s5613_s19, 32  ;;  %s4915_s24 = scalar_lea.hbm %s6381_s5, 64 }
  0x95   : > { %p4911_p11 = scmp.ne.s32.totalorder %s5613_s19, %s4910_s20  ;;  %p4916_p4 = scmp.lt.u32.totalorder %s5613_s19, %s6381_s5 }
  0x96   : > { %p4917_p6 = scmp.lt.u32.totalorder %s4915_s24, %s4910_s20  ;;  %p4919_p1 = scmp.lt.u32.totalorder %s4910_s20, %s5613_s19 }
  0x97   : > { %p4913_p3 = pnand %p4911_p11, %p5524_p10 }
  0x98   : > { %p4918_p12 = por %p4917_p6, %p4916_p4 }
  0x99   : > { %p4914_p13 = pneg %p4913_p3 }
  0x9a   : > { %p4920_p7 = por %p4919_p1, %p4918_p12 }
  0x9c   : > { %p4921_p5 = pnand %p4920_p7, %p4914_p13 }
  0x9e   : > { %4924 = shalt.err (!%p4921_p5)
}
  0x9f   : > { %s4925_s13 = scalar_lea.vmem %s554_s2, 32  ;;  %s5308_s26 = smov [#allocation10]  }
  0xa0   : > { %p4926_p2 = scmp.ne.s32.totalorder %s554_s2, %s4925_s13  ;;  %s4930_s15 = sshll.u32 %s5308_s26, 4  ;;  %s4931_s15 = int_to_ptr.vmem [resolvable:$false] %s4930_s15 }
  0xa1   : > { %s4932_s28 = scalar_lea.vmem %s4931_s15, 64  ;;  %p4933_p11 = scmp.lt.s32.totalorder %s554_s2, %s4931_s15 }
  0xa2   : > { %p4928_p0 = pnand %p4926_p2, %p5524_p10  ;;  %p4934_p3 = scmp.lt.s32.totalorder %s4932_s28, %s4925_s13 }
  0xa4   : > { %p4929_p8 = pneg %p4928_p0  ;;  %p4935_p9 = por %p4934_p3, %p4933_p11 }
  0xa6   : > { %p4936_p4 = pnand %p4935_p9, %p4929_p8 }
  0xa8   : > { %4939 = shalt.err (!%p4936_p4)
}
  0xa9   : > { %p6453_p6 = scmp.ne.s32.totalorder %s6447_s25, 0  ;;  %s5638_s30 = scalar_lea.hbm %s6382_s6, %s5607_s22 }
  0xaa   : > { %s564_s24 = scalar_lea.vmem [#allocation11], %s5579_s27  ;;  %s4940_s1 = scalar_lea.hbm %s5638_s30, 32 }
  0xab   : > { %4286 = dma.hbm_to_vmem [thread:$0]  (!%p6453_p6), %s5613_s19, 32, %s554_s2, %s5518_s14  }
  0xac   : > { %s572_s16 = sshll.u32 %s564_s24, 4  ;;  %p4941_p9 = scmp.ne.s32.totalorder %s5638_s30, %s4940_s1  ;;  %s573_s16 = int_to_ptr.vmem [resolvable:$true] %s572_s16 }
  0xad   : > { %s4945_s19 = scalar_lea.hbm %s6382_s6, 64  ;;  %p4946_p1 = scmp.lt.u32.totalorder %s5638_s30, %s6382_s6 }
  0xae   : > { %p4943_p13 = pnand %p4941_p9, %p5524_p10  ;;  %p4947_p7 = scmp.lt.u32.totalorder %s4945_s19, %s4940_s1 }
  0xaf   : > { %p4949_p2 = scmp.lt.u32.totalorder %s4940_s1, %s5638_s30 }
  0xb0   : > { %p4944_p12 = pneg %p4943_p13  ;;  %p4948_p5 = por %p4947_p7, %p4946_p1 }
  0xb2   : > { %p4950_p0 = por %p4949_p2, %p4948_p5 }
  0xb4   : > { %p4951_p8 = pnand %p4950_p0, %p4944_p12 }
  0xb6   : > { %4954 = shalt.err (!%p4951_p8)
}
  0xb7   : > { %s4955_s28 = scalar_lea.vmem %s573_s16, 32  ;;  %s5309_s20 = smov [#allocation11]  }
  0xb8   : > { %p4956_p11 = scmp.ne.s32.totalorder %s573_s16, %s4955_s28  ;;  %s4960_s23 = sshll.u32 %s5309_s20, 4  ;;  %s4961_s23 = int_to_ptr.vmem [resolvable:$false] %s4960_s23 }
  0xb9   : > { %s4962_s24 = scalar_lea.vmem %s4961_s23, 64  ;;  %p4963_p9 = scmp.lt.s32.totalorder %s573_s16, %s4961_s23 }
  0xba   : > { %p4958_p3 = pnand %p4956_p11, %p5524_p10  ;;  %p4964_p13 = scmp.lt.s32.totalorder %s4962_s24, %s4955_s28 }
  0xbc   : > { %p4959_p4 = pneg %p4958_p3  ;;  %p4965_p6 = por %p4964_p13, %p4963_p9 }
  0xbe   : > { %p4966_p1 = pnand %p4965_p6, %p4959_p4 }
  0xc0   : > { %4969 = shalt.err (!%p4966_p1)
}
  0xc1   : > { %p6454_p7 = scmp.ne.s32.totalorder %s6447_s25, 0  ;;  %s5663_s26 = scalar_lea.hbm %s6383_s7, %s5607_s22 }
  0xc2   : > { %s583_s19 = scalar_lea.vmem [#allocation12], %s5579_s27  ;;  %s3841_s15 = sshll.u32 %s5504_s21, 9 }
  0xc3   : > { %4289 = dma.hbm_to_vmem [thread:$0]  (!%p6454_p7), %s5638_s30, 32, %s573_s16, %s5518_s14  }
  0xc4   : > { %s591_s2 = sshll.u32 %s583_s19, 4  ;;  %s4970_s28 = scalar_lea.hbm %s5663_s26, 32  ;;  %s592_s2 = int_to_ptr.vmem [resolvable:$true] %s591_s2 }
  0xc5   : > { %p4971_p6 = scmp.ne.s32.totalorder %s5663_s26, %s4970_s28  ;;  %s4975_s16 = scalar_lea.hbm %s6383_s7, 64 }
  0xc6   : > { %p4976_p2 = scmp.lt.u32.totalorder %s5663_s26, %s6383_s7  ;;  %p4977_p0 = scmp.lt.u32.totalorder %s4975_s16, %s4970_s28 }
  0xc7   : > { %p4973_p12 = pnand %p4971_p6, %p5524_p10  ;;  %p4979_p11 = scmp.lt.u32.totalorder %s4970_s28, %s5663_s26 }
  0xc8   : > { %p4978_p8 = por %p4977_p0, %p4976_p2 }
  0xc9   : > { %p4974_p5 = pneg %p4973_p12 }
  0xca   : > { %p4980_p3 = por %p4979_p11, %p4978_p8 }
  0xcc   : > { %p4981_p4 = pnand %p4980_p3, %p4974_p5 }
  0xce   : > { %4984 = shalt.err (!%p4981_p4)
}
  0xcf   : > { %s4985_s1 = scalar_lea.vmem %s592_s2, 32  ;;  %s5310_s13 = smov [#allocation12]  }
  0xd0   : > { %p4986_p9 = scmp.ne.s32.totalorder %s592_s2, %s4985_s1  ;;  %s4990_s19 = sshll.u32 %s5310_s13, 4  ;;  %s4991_s19 = int_to_ptr.vmem [resolvable:$false] %s4990_s19 }
  0xd1   : > { %s4992_s20 = scalar_lea.vmem %s4991_s19, 64  ;;  %p4993_p6 = scmp.lt.s32.totalorder %s592_s2, %s4991_s19 }
  0xd2   : > { %p4988_p13 = pnand %p4986_p9, %p5524_p10  ;;  %p4994_p12 = scmp.lt.s32.totalorder %s4992_s20, %s4985_s1 }
  0xd4   : > { %p4989_p1 = pneg %p4988_p13  ;;  %p4995_p7 = por %p4994_p12, %p4993_p6 }
  0xd6   : > { %p4996_p0 = pnand %p4995_p7, %p4989_p1 }
  0xd8   : > { %4999 = shalt.err (!%p4996_p0)
}
  0xd9   : > { %p6455_p2 = scmp.ne.s32.totalorder %s6447_s25, 0  ;;  %s4145_s28 = sshll.u32 %s5292_s17, 13 }
  0xda   : > { %s5691_s23 = scalar_lea.hbm %s6384_s8, %s4145_s28  ;;  %s602_s24 = scalar_lea.vmem [#allocation13], %s3841_s15 }
  0xdb   : > { %4292 = dma.hbm_to_vmem [thread:$0]  (!%p6455_p2), %s5663_s26, 32, %s592_s2, %s5518_s14  }
  0xdc   : > { %s609_s1 = sshll.u32 %s602_s24, 4  ;;  %s3844_s13 = sshll.u32 %s5504_s21, 2  ;;  %s5695_s1 = int_to_ptr.vmem [resolvable:$true] %s609_s1 }
  0xdd   : > { %s5000_s19 = scalar_lea.hbm %s5691_s23, 8192  ;;  %s5005_s20 = scalar_lea.hbm %s6384_s8, 16384 }
  0xde   : > { %p5001_p7 = scmp.ne.s32.totalorder %s5691_s23, %s5000_s19  ;;  %p5006_p11 = scmp.lt.u32.totalorder %s5691_s23, %s6384_s8 }
  0xdf   : > { %p5007_p3 = scmp.lt.u32.totalorder %s5005_s20, %s5000_s19  ;;  %p5009_p9 = scmp.lt.u32.totalorder %s5000_s19, %s5691_s23 }
  0xe0   : > { %p5003_p5 = pnand %p5001_p7, %p5524_p10 }
  0xe1   : > { %p5008_p4 = por %p5007_p3, %p5006_p11 }
  0xe2   : > { %p5004_p8 = pneg %p5003_p5 }
  0xe3   : > { %p5010_p13 = por %p5009_p9, %p5008_p4 }
  0xe5   : > { %p5011_p1 = pnand %p5010_p13, %p5004_p8 }
  0xe7   : > { %5014 = shalt.err (!%p5011_p1)
}
  0xe8   : > { %s5015_s24 = scalar_lea.vmem %s5695_s1, 8192  ;;  %s5311_s26 = smov [#allocation13]  }
  0xe9   : > { %p5016_p6 = scmp.ne.s32.totalorder %s5695_s1, %s5015_s24  ;;  %s5020_s2 = sshll.u32 %s5311_s26, 4  ;;  %s5021_s2 = int_to_ptr.vmem [resolvable:$false] %s5020_s2 }
  0xea   : > { %s5022_s30 = scalar_lea.vmem %s5021_s2, 16384  ;;  %p5023_p7 = scmp.lt.s32.totalorder %s5695_s1, %s5021_s2 }
  0xeb   : > { %p5018_p12 = pnand %p5016_p6, %p5524_p10  ;;  %p5024_p5 = scmp.lt.s32.totalorder %s5022_s30, %s5015_s24 }
  0xed   : > { %p5019_p0 = pneg %p5018_p12  ;;  %p5025_p11 = por %p5024_p5, %p5023_p7 }
  0xef   : > { %p5026_p3 = pnand %p5025_p11, %p5019_p0 }
  0xf1   : > { %5029 = shalt.err (!%p5026_p3)
}
  0xf2   : > { %s6456_s19 = smov 16   ;;  %s6457_s20 = smov 256  }
  0xf3   : > { %4295 = dma.hbm_to_vmem [thread:$0]  (!%p6455_p2), %s5691_s23, 8192, %s5695_s1, %s5518_s14, %s6457_s20, %s6457_s20, %s6456_s19  }
  0xf4   : > { %s4146_s16 = sshll.u32 %s5292_s17, 6  ;;  %s623_s2 = scalar_lea.vmem [#allocation14], %s3844_s13 }
  0xf5   : > { %s5727_s24 = scalar_lea.hbm %s6385_s9, %s4146_s16  ;;  %s631_s30 = sshll.u32 %s623_s2, 4  ;;  %s632_s30 = int_to_ptr.vmem [resolvable:$true] %s631_s30 }
  0xf6   : > { %s5030_s29 = scalar_lea.hbm %s5727_s24, 64  ;;  %s5035_s20 = scalar_lea.hbm %s6385_s9, 128 }
  0xf7   : > { %p5031_p8 = scmp.ne.s32.totalorder %s5727_s24, %s5030_s29  ;;  %p5036_p13 = scmp.lt.u32.totalorder %s5727_s24, %s6385_s9 }
  0xf8   : > { %p5037_p1 = scmp.lt.u32.totalorder %s5035_s20, %s5030_s29  ;;  %p5039_p12 = scmp.lt.u32.totalorder %s5030_s29, %s5727_s24 }
  0xf9   : > { %p5033_p4 = pnand %p5031_p8, %p5524_p10 }
  0xfa   : > { %p5038_p6 = por %p5037_p1, %p5036_p13 }
  0xfb   : > { %p5034_p9 = pneg %p5033_p4 }
  0xfc   : > { %p5040_p0 = por %p5039_p12, %p5038_p6 }
  0xfe   : > { %p5041_p7 = pnand %p5040_p0, %p5034_p9 }
 0x100   : > { %5044 = shalt.err (!%p5041_p7)
}
 0x101   : > { %s5045_s13 = scalar_lea.vmem %s632_s30, 64  ;;  %s5312_s26 = smov [#allocation14]  }
 0x102   : > { %p5046_p5 = scmp.ne.s32.totalorder %s632_s30, %s5045_s13  ;;  %s5050_s2 = sshll.u32 %s5312_s26, 4  ;;  %s5051_s2 = int_to_ptr.vmem [resolvable:$false] %s5050_s2 }
 0x103   : > { %s5052_s23 = scalar_lea.vmem %s5051_s2, 128  ;;  %p5053_p8 = scmp.lt.s32.totalorder %s632_s30, %s5051_s2 }
 0x104   : > { %p5048_p11 = pnand %p5046_p5, %p5524_p10  ;;  %p5054_p4 = scmp.lt.s32.totalorder %s5052_s23, %s5045_s13 }
 0x106   : > { %p5049_p3 = pneg %p5048_p11  ;;  %p5055_p2 = por %p5054_p4, %p5053_p8 }
 0x108   : > { %p5056_p1 = pnand %p5055_p2, %p5049_p3 }
 0x10a   : > { %5059 = shalt.err (!%p5056_p1)
}
 0x10b   : > { %p6458_p13 = scmp.ne.s32.totalorder %s6447_s25, 0  ;;  %s5754_s20 = scalar_lea.hbm %s6386_s10, %s4145_s28 }
 0x10c   : > { %s642_s18 = scalar_lea.vmem [#allocation15], %s3841_s15  ;;  %s5060_s13 = scalar_lea.hbm %s5754_s20, 8192 }
 0x10d   : > { %4298 = dma.hbm_to_vmem [thread:$0]  (!%p6458_p13), %s5727_s24, 64, %s632_s30, %s5518_s14  }
 0x10e   : > { %s649_s16 = sshll.u32 %s642_s18, 4  ;;  %p5061_p2 = scmp.ne.s32.totalorder %s5754_s20, %s5060_s13  ;;  %s5758_s16 = int_to_ptr.vmem [resolvable:$true] %s649_s16 }
 0x10f   : > { %s5065_s26 = scalar_lea.hbm %s6386_s10, 16384  ;;  %p5066_p12 = scmp.lt.u32.totalorder %s5754_s20, %s6386_s10 }
 0x110   : > { %p5063_p9 = pnand %p5061_p2, %p5524_p10  ;;  %p5067_p0 = scmp.lt.u32.totalorder %s5065_s26, %s5060_s13 }
 0x111   : > { %p5069_p5 = scmp.lt.u32.totalorder %s5060_s13, %s5754_s20 }
 0x112   : > { %p5064_p6 = pneg %p5063_p9  ;;  %p5068_p7 = por %p5067_p0, %p5066_p12 }
 0x114   : > { %p5070_p11 = por %p5069_p5, %p5068_p7 }
 0x116   : > { %p5071_p3 = pnand %p5070_p11, %p5064_p6 }
 0x118   : > { %5074 = shalt.err (!%p5071_p3)
}
 0x119   : > { %s5075_s21 = scalar_lea.vmem %s5758_s16, 8192  ;;  %s5313_s15 = smov [#allocation15]  }
 0x11a   : > { %p5076_p8 = scmp.ne.s32.totalorder %s5758_s16, %s5075_s21  ;;  %s5080_s23 = sshll.u32 %s5313_s15, 4  ;;  %s5081_s23 = int_to_ptr.vmem [resolvable:$false] %s5080_s23 }
 0x11b   : > { %s5082_s29 = scalar_lea.vmem %s5081_s23, 16384  ;;  %p5083_p2 = scmp.lt.s32.totalorder %s5758_s16, %s5081_s23 }
 0x11c   : > { %p5078_p4 = pnand %p5076_p8, %p5524_p10  ;;  %p5084_p9 = scmp.lt.s32.totalorder %s5082_s29, %s5075_s21 }
 0x11e   : > { %p5079_p1 = pneg %p5078_p4  ;;  %p5085_p12 = por %p5084_p9, %p5083_p2 }
 0x120   : > { %p5086_p0 = pnand %p5085_p12, %p5079_p1 }
 0x122   : > { %5089 = shalt.err (!%p5086_p0)
}
 0x123   : > { %s6459_s1 = smov 8   ;;  %s6460_s18 = smov 128  }
 0x124   : > { %4301 = dma.hbm_to_vmem [thread:$0]  (!%p6458_p13), %s5754_s20, 8192, %s5758_s16, %s5518_s14, %s6460_s18, %s6460_s18, %s6459_s1  }
 0x125   : > { %s5789_s30 = scalar_lea.hbm %s6387_s11, %s5607_s22  ;;  %s663_s26 = scalar_lea.vmem [#allocation16], %s5579_s27 }
 0x126   : > { %s671_s28 = sshll.u32 %s663_s26, 4  ;;  %s5090_s2 = scalar_lea.hbm %s5789_s30, 32  ;;  %s672_s28 = int_to_ptr.vmem [resolvable:$true] %s671_s28 }
 0x127   : > { %p5091_p6 = scmp.ne.s32.totalorder %s5789_s30, %s5090_s2  ;;  %s5095_s20 = scalar_lea.hbm %s6387_s11, 64 }
 0x128   : > { %p5096_p11 = scmp.lt.u32.totalorder %s5789_s30, %s6387_s11  ;;  %p5097_p3 = scmp.lt.u32.totalorder %s5095_s20, %s5090_s2 }
 0x129   : > { %p5093_p7 = pnand %p5091_p6, %p5524_p10  ;;  %p5099_p4 = scmp.lt.u32.totalorder %s5090_s2, %s5789_s30 }
 0x12a   : > { %p5098_p8 = por %p5097_p3, %p5096_p11 }
 0x12b   : > { %p5094_p5 = pneg %p5093_p7 }
 0x12c   : > { %p5100_p1 = por %p5099_p4, %p5098_p8 }
 0x12e   : > { %p5101_p2 = pnand %p5100_p1, %p5094_p5 }
 0x130   : > { %5104 = shalt.err (!%p5101_p2)
}
 0x131   : > { %s5105_s29 = scalar_lea.vmem %s672_s28, 32  ;;  %s5314_s1 = smov [#allocation16]  }
 0x132   : > { %p5106_p9 = scmp.ne.s32.totalorder %s672_s28, %s5105_s29  ;;  %s5110_s18 = sshll.u32 %s5314_s1, 4  ;;  %s5111_s18 = int_to_ptr.vmem [resolvable:$false] %s5110_s18 }
 0x133   : > { %s5112_s13 = scalar_lea.vmem %s5111_s18, 64  ;;  %p5113_p6 = scmp.lt.s32.totalorder %s672_s28, %s5111_s18 }
 0x134   : > { %p5108_p12 = pnand %p5106_p9, %p5524_p10  ;;  %p5114_p7 = scmp.lt.s32.totalorder %s5112_s13, %s5105_s29 }
 0x136   : > { %p5109_p0 = pneg %p5108_p12  ;;  %p5115_p13 = por %p5114_p7, %p5113_p6 }
 0x138   : > { %p5116_p3 = pnand %p5115_p13, %p5109_p0 }
 0x13a   : > { %5119 = shalt.err (!%p5116_p3)
}
 0x13b   : > { %p6461_p11 = scmp.ne.s32.totalorder %s6447_s25, 0  ;;  %s5814_s2 = scalar_lea.hbm %s6388_s12, %s5607_s22 }
 0x13c   : > { %s682_s21 = scalar_lea.vmem [#allocation17], %s5579_s27  ;;  %s5120_s20 = scalar_lea.hbm %s5814_s2, 32 }
 0x13d   : > { %4304 = dma.hbm_to_vmem [thread:$0]  (!%p6461_p11), %s5789_s30, 32, %s672_s28, %s5518_s14  }
 0x13e   : > { %s690_s15 = sshll.u32 %s682_s21, 4  ;;  %p5121_p13 = scmp.ne.s32.totalorder %s5814_s2, %s5120_s20  ;;  %s691_s15 = int_to_ptr.vmem [resolvable:$true] %s690_s15 }
 0x13f   : > { %s5125_s30 = scalar_lea.hbm %s6388_s12, 64  ;;  %p5126_p4 = scmp.lt.u32.totalorder %s5814_s2, %s6388_s12 }
 0x140   : > { %p5123_p5 = pnand %p5121_p13, %p5524_p10  ;;  %p5127_p1 = scmp.lt.u32.totalorder %s5125_s30, %s5120_s20 }
 0x141   : > { %p5129_p9 = scmp.lt.u32.totalorder %s5120_s20, %s5814_s2 }
 0x142   : > { %p5124_p8 = pneg %p5123_p5  ;;  %p5128_p2 = por %p5127_p1, %p5126_p4 }
 0x144   : > { %p5130_p12 = por %p5129_p9, %p5128_p2 }
 0x146   : > { %p5131_p0 = pnand %p5130_p12, %p5124_p8 }
 0x148   : > { %5134 = shalt.err (!%p5131_p0)
}
 0x149   : > { %s5135_s1 = scalar_lea.vmem %s691_s15, 32  ;;  %s5315_s18 = smov [#allocation17]  }
 0x14a   : > { %p5136_p6 = scmp.ne.s32.totalorder %s691_s15, %s5135_s1  ;;  %s5140_s13 = sshll.u32 %s5315_s18, 4  ;;  %s5141_s13 = int_to_ptr.vmem [resolvable:$false] %s5140_s13 }
 0x14b   : > { %s5142_s24 = scalar_lea.vmem %s5141_s13, 64  ;;  %p5143_p13 = scmp.lt.s32.totalorder %s691_s15, %s5141_s13 }
 0x14c   : > { %p5138_p7 = pnand %p5136_p6, %p5524_p10  ;;  %p5144_p5 = scmp.lt.s32.totalorder %s5142_s24, %s5135_s1 }
 0x14e   : > { %p5139_p3 = pneg %p5138_p7  ;;  %p5145_p11 = por %p5144_p5, %p5143_p13 }
 0x150   : > { %p5146_p1 = pnand %p5145_p11, %p5139_p3 }
 0x152   : > { %5149 = shalt.err (!%p5146_p1)
}
 0x153   : > { %p6462_p4 = scmp.ne.s32.totalorder %s6447_s25, 0  ;;  %s6463_s26 = sld [smem:[#allocation33_spill]] }
 0x154   : > { %s5316_s21 = smov [#allocation5]   ;;  %s6464_s30 = sld [smem:[#allocation35_spill]] }
 0x155   : > { %4307 = dma.hbm_to_vmem [thread:$0]  (!%p6462_p4), %s5814_s2, 32, %s691_s15, %s5518_s14  }
 0x156   : > { %s466_s20 = sshll.u32 %s5316_s21, 4  ;;  %s467_s20 = int_to_ptr.vmem [resolvable:$true] %s466_s20 }
 0x159   : > { %p6466_p2 = scmp.ne.s32.totalorder %s6463_s26, 0 }
 0x15a   : > { %s6465_s28 = smov %s6464_s30  ;;  %s5150_s29 = scalar_lea.hbm %s6464_s30, 32 }
 0x15b   : > { %p5151_p8 = scmp.ne.s32.totalorder %s6465_s28, %s5150_s29  ;;  %p6467_p11 = pneg %p6466_p2 }
 0x15c   : > { %p5157_p0 = scmp.lt.u32.totalorder %s5150_s29, %s6465_s28 }
 0x15d   : > { %p5153_p9 = pnand %p5151_p8, %p6467_p11 }
 0x15f   : > { %p5154_p12 = pneg %p5153_p9 }
 0x161   : > { %p5159_p6 = pnand %p5157_p0, %p5154_p12 }
 0x163   : > { %5162 = shalt.err (!%p5159_p6)
}
 0x164   : > { %s5163_s2 = scalar_lea.vmem %s467_s20, 32  ;;  %p6468_p3 = pmov %p6467_p11 }
 0x165   : > { %p5164_p7 = scmp.ne.s32.totalorder %s467_s20, %s5163_s2  ;;  %p5171_p1 = scmp.lt.s32.totalorder %s467_s20, %s467_s20 }
 0x166   : > { %p5172_p4 = scmp.lt.s32.totalorder %s5163_s2, %s5163_s2 }
 0x167   : > { %p5166_p13 = pnand %p5164_p7, %p6468_p3 }
 0x168   : > { %p5173_p10 = por %p5172_p4, %p5171_p1 }
 0x169   : > { %p5167_p5 = pneg %p5166_p13 }
 0x16b   : > { %p5174_p8 = pnand %p5173_p10, %p5167_p5 }
 0x16d   : > { %5177 = shalt.err (!%p5174_p8)
}
 0x16e   : > { %s5317_s3 = smov 1   ;;  %s6469_s23 = sld [smem:[#allocation38_spill]] }
 0x16f   : > { %4273 = dma.hbm_to_vmem [thread:$0]  (!%p6466_p2), %s6465_s28, 32, %s467_s20, [#allocation6], %s6456_s19, %s6456_s19, %s5317_s3  }
 0x170   : > { %s701_s29 = scalar_lea.vmem [#allocation18], %s5579_s27  ;;  %p6470_p4 = scmp.ne.s32.totalorder %s6450_s0, 0 }
 0x171   : > { %s709_s26 = sshll.u32 %s701_s29, 4  ;;  %s710_s26 = int_to_ptr.vmem [resolvable:$true] %s709_s26 }
 0x174   : > { %s5861_s30 = scalar_lea.hbm %s6469_s23, %s5607_s22  ;;  %s5183_s19 = scalar_lea.hbm %s6469_s23, 64 }
 0x175   : > { %s5178_s18 = scalar_lea.hbm %s5861_s30, 32  ;;  %p5184_p2 = scmp.lt.u32.totalorder %s5861_s30, %s6469_s23 }
 0x176   : > { %p5179_p10 = scmp.ne.s32.totalorder %s5861_s30, %s5178_s18  ;;  %p5185_p12 = scmp.lt.u32.totalorder %s5183_s19, %s5178_s18 }
 0x177   : > { %p5187_p6 = scmp.lt.u32.totalorder %s5178_s18, %s5861_s30 }
 0x178   : > { %p5181_p11 = pnand %p5179_p10, %p6470_p4  ;;  %p5186_p0 = por %p5185_p12, %p5184_p2 }
 0x17a   : > { %p5182_p9 = pneg %p5181_p11  ;;  %p5188_p7 = por %p5187_p6, %p5186_p0 }
 0x17c   : > { %p5189_p3 = pnand %p5188_p7, %p5182_p9 }
 0x17e   : > { %5192 = shalt.err (!%p5189_p3)
}
 0x17f   : > { %s5193_s27 = scalar_lea.vmem %s710_s26, 32  ;;  %s5318_s22 = smov [#allocation18]  }
 0x180   : > { %p5194_p13 = scmp.ne.s32.totalorder %s710_s26, %s5193_s27  ;;  %s5198_s3 = sshll.u32 %s5318_s22, 4  ;;  %s5199_s3 = int_to_ptr.vmem [resolvable:$false] %s5198_s3 }
 0x181   : > { %s5200_s15 = scalar_lea.vmem %s5199_s3, 64  ;;  %p5201_p8 = scmp.lt.s32.totalorder %s710_s26, %s5199_s3 }
 0x182   : > { %p5196_p5 = pnand %p5194_p13, %p6470_p4  ;;  %p5202_p10 = scmp.lt.s32.totalorder %s5200_s15, %s5193_s27 }
 0x184   : > { %p5197_p1 = pneg %p5196_p5  ;;  %p5203_p11 = por %p5202_p10, %p5201_p8 }
 0x186   : > { %p5204_p2 = pnand %p5203_p11, %p5197_p1 }
 0x188   : > { %5207 = shalt.err (!%p5204_p2)
}
 0x189   : > { %p6471_p12 = scmp.ne.s32.totalorder %s6447_s25, 0  ;;  %s6472_s24 = sld [smem:[#allocation32_spill]] }
 0x18b   : > { %4310 = dma.hbm_to_vmem [thread:$0]  (!%p6471_p12), %s5861_s30, 32, %s710_s26, %s5518_s14  }
 0x18f   : > { %p6473_p9 = scmp.ne.s32.totalorder %s6472_s24, 0 }
 0x190   : > { %s6474_s0 = sld [smem:[#allocation28_spill]] (!%p6473_p9) }
 0x191   : > { %718 = sbr.rel (%p6473_p9) target bundleno = 2871 (0xb37), region = 76 }
 0x196   : > { %p6475_p4 = scmp.eq.s32.totalorder (!%p6473_p9), %s6474_s0, 0 }
 0x198   : > { %5259 = dma.done.wait (%p6475_p4), [#allocation3], 512   ;;  %p6476_p0 = pmov %p6475_p4 }
 0x19a   : > { %5261 = vsyncadd (%p6476_p0), [#allocation3], 4294966784  ;;  %p6477_p6 = pmov %p6476_p0 }
 0x19b   : > { %p6478_p7 = pmov %p6476_p0 }
 0x19c   : > { %5263 = dma.done.wait (%p6477_p6), [#allocation6], 32  }
 0x19d   : > { %5265 = vsyncadd (%p6478_p7), [#allocation6], 4294967264  ;;  %s6479_s25 = sld [smem:[#allocation24_spill]]  ;;  %s6480_s21 = sld [smem:[#allocation30_spill]] }
 0x19e   : > { %s728_s16 = sand.u32 1, %s6474_s0  }
 0x19f   : > { %s729_s29 = scalar_lea.sflag [#allocation3], %s728_s16 }
 0x1a3   : > { %s730_s14 = sand.u32 1, %s6479_s25   ;;  %p6481_p3 = scmp.ne.s32.totalorder %s6480_s21, 0 }
 0x1a4   : > { %s4229_s30 = smul.u32 768, %s730_s14 }
 0x1a6   : > { %s5894_s26 = scalar_lea.vmem [#allocation7], %s4229_s30 }
 0x1a7   : > { %5267 = dma.done.wait (%p6481_p3), %s729_s29, 33120  }
 0x1a8   : > { %5269 = vsyncadd (%p6481_p3), %s729_s29, 4294934176  ;;  %s4230_s18 = smul.u32 6, %s730_s14  ;;  %s3862_s1 = sshll.u32 %s730_s14, 8 }
 0x1a9   : > { %s5900_s13 = sshll.u32 %s730_s14, 1  ;;  %s3866_s19 = sshll.u32 %s730_s14, 9 }
 0x1aa   : > { %s3867_s20 = sshll.u32 %s730_s14, 2  ;;  %s5902_s2 = scalar_lea.vmem [#allocation8], %s4230_s18 }
 0x1ab   : > { %s5904_s27 = scalar_lea.vmem [#allocation9], %s3862_s1  ;;  %s759_s22 = scalar_lea.vmem [#allocation10], %s5900_s13 }
 0x1ac   : > { %s768_s3 = scalar_lea.vmem [#allocation11], %s5900_s13  ;;  %s777_s15 = scalar_lea.vmem [#allocation12], %s5900_s13 }
 0x1ad   : > { %s5909_s24 = scalar_lea.vmem [#allocation13], %s3866_s19  ;;  %s5911_s0 = scalar_lea.vmem [#allocation14], %s3867_s20 }
 0x1ae   : > { %s5913_s25 = scalar_lea.vmem [#allocation15], %s3866_s19  ;;  %s813_s21 = scalar_lea.vmem [#allocation16], %s5900_s13 }
 0x1af   : > { %s822_s16 = scalar_lea.vmem [#allocation17], %s5900_s13  ;;  %s831_s30 = scalar_lea.vmem [#allocation18], %s5900_s13 }
 0x1b0   : > { %s6482_s29 = sld [smem:[#allocation26_spill]] }
 0x1b6   : > { %p3872_p13 = scmp.ne.s32.totalorder %s6482_s29, 0 }
 0x1b7   : > { %v934_v0 = vld [vmem:[#allocation2] sm:$0xff] (!%p3872_p13)  ;;  %v935_v1 = vld [vmem:[#allocation2 + $0x8] sm:$0xff] (!%p3872_p13)  ;;  %v936_v2 = vld [vmem:[#allocation2 + $0x10] sm:$0xff] (!%p3872_p13) }
 0x1b8   : > { %933 = sbr.rel (%p3872_p13) target bundleno = 447 (0x1bf), region = 136  ;;  %938 = vst [vmem:[#allocation19] sm:$0xff] (!%p3872_p13), %v934_v0  ;;  %939 = vst [vmem:[#allocation19 + $0x8] sm:$0xff] (!%p3872_p13), %v935_v1  ;;  %v937_v3 = vld [vmem:[#allocation2 + $0x18] sm:$0xff] (!%p3872_p13) }
 0x1b9   : > { %940 = vst [vmem:[#allocation19 + $0x10] sm:$0xff] (!%p3872_p13), %v936_v2  ;;  %941 = vst [vmem:[#allocation19 + $0x18] sm:$0xff] (!%p3872_p13), %v937_v3 }
 0x1bf PF: > { %v4380_v4 = vld [vmem:[%s5894_s26 + $0xc] ss:$24 sps:$4 sm:$0xff]   ;;  %v4382_v5 = vld [vmem:[%s5894_s26 + $0x8] ss:$24 sps:$4 sm:$0xff]   ;;  %v4383_v6 = vld [vmem:[%s5894_s26 + $0x3c] ss:$24 sps:$4 sm:$0xff]  }
 0x1c0   : > { %1599 = vmatprep.subr.bf16.mxu1 %v4380_v4  ;;  %v4385_v7 = vld [vmem:[%s5894_s26 + $0x4] ss:$24 sps:$4 sm:$0xff]   ;;  %v4387_v8 = vld [vmem:[%s5894_s26 + $0x38] ss:$24 sps:$4 sm:$0xff]   ;;  %v4391_v11 = vld [vmem:[%s5894_s26 + $0x34] ss:$24 sps:$4 sm:$0xff]  }
 0x1c1   : > { %1600 = vmatpush1.bf16.msra.mxu1 %v4382_v5  ;;  %v4388_v9 = vld [vmem:[%s5894_s26] ss:$24 sps:$4 sm:$0xff]   ;;  %v4389_v10 = vld [vmem:[%s5894_s26 + $0x6c] ss:$24 sps:$4 sm:$0xff]   ;;  %1556 = vmatprep.subr.bf16.mxu0 %v4385_v7  ;;  %v4394_v12 = vld [vmem:[%s5894_s26 + $0x30] ss:$24 sps:$4 sm:$0xff]  }
 0x1c2   : > { %1601 = vmatprep.subr.bf16.mxu1 %v4383_v6  ;;  %1557 = vmatpush1.bf16.msra.mxu0 %v4388_v9  ;;  %v4393_v13 = vld [vmem:[%s5894_s26 + $0x68] ss:$24 sps:$4 sm:$0xff]   ;;  %v4395_v14 = vld [vmem:[%s5894_s26 + $0x9c] ss:$24 sps:$4 sm:$0xff]   ;;  %v4399_v17 = vld [vmem:[%s5894_s26 + $0x98] ss:$24 sps:$4 sm:$0xff]  }
 0x1c3   : > { %1558 = vmatprep.subr.bf16.mxu0 %v4391_v11  ;;  %v4397_v15 = vld [vmem:[%s5894_s26 + $0x64] ss:$24 sps:$4 sm:$0xff]   ;;  %v4400_v16 = vld [vmem:[%s5894_s26 + $0x60] ss:$24 sps:$4 sm:$0xff]   ;;  %v4403_v18 = vld [vmem:[%s5894_s26 + $0x94] ss:$24 sps:$4 sm:$0xff]  }
 0x1c4   : > { %v4401_v19 = vld [vmem:[%s5894_s26 + $0xcc] ss:$24 sps:$4 sm:$0xff]   ;;  %v4405_v20 = vld [vmem:[%s5894_s26 + $0xc8] ss:$24 sps:$4 sm:$0xff]   ;;  %v4407_v23 = vld [vmem:[%s5894_s26 + $0xfc] ss:$24 sps:$4 sm:$0xff]  }
 0x1c5   : > { %1602 = vmatpush1.bf16.msra.mxu1 %v4387_v8  ;;  %v4406_v21 = vld [vmem:[%s5894_s26 + $0x90] ss:$24 sps:$4 sm:$0xff]   ;;  %v4409_v22 = vld [vmem:[%s5894_s26 + $0xc4] ss:$24 sps:$4 sm:$0xff]   ;;  %v4412_v24 = vld [vmem:[%s5894_s26 + $0xc0] ss:$24 sps:$4 sm:$0xff]  }
 0x1c6   : > { %1603 = vmatprep.subr.bf16.mxu1 %v4389_v10  ;;  %1559 = vmatpush1.bf16.msra.mxu0 %v4394_v12  ;;  %v4411_v25 = vld [vmem:[%s5894_s26 + $0xf8] ss:$24 sps:$4 sm:$0xff]   ;;  %v4415_v26 = vld [vmem:[%s5894_s26 + $0xf4] ss:$24 sps:$4 sm:$0xff]   ;;  %v4417_v28 = vld [vmem:[%s5894_s26 + $0x128] ss:$24 sps:$4 sm:$0xff]  }
 0x1c7   : > { %1560 = vmatprep.subr.bf16.mxu0 %v4397_v15  ;;  %v4413_v27 = vld [vmem:[%s5894_s26 + $0x12c] ss:$24 sps:$4 sm:$0xff]   ;;  %v4418_v29 = vld [vmem:[%s5894_s26 + $0xf0] ss:$24 sps:$4 sm:$0xff]   ;;  %v4419_v31 = vld [vmem:[%s5894_s26 + $0x15c] ss:$24 sps:$4 sm:$0xff]  }
 0x1c8   : > { %v4421_v30 = vld [vmem:[%s5894_s26 + $0x124] ss:$24 sps:$4 sm:$0xff]   ;;  %v4424_v32 = vld [vmem:[%s5894_s26 + $0x120] ss:$24 sps:$4 sm:$0xff]   ;;  %v4427_v34 = vld [vmem:[%s5894_s26 + $0x154] ss:$24 sps:$4 sm:$0xff]  }
 0x1c9   : > { %1604 = vmatpush1.bf16.msra.mxu1 %v4393_v13  ;;  %v4423_v33 = vld [vmem:[%s5894_s26 + $0x158] ss:$24 sps:$4 sm:$0xff]   ;;  %v4425_v35 = vld [vmem:[%s5894_s26 + $0x18c] ss:$24 sps:$4 sm:$0xff]   ;;  %v4429_v36 = vld [vmem:[%s5894_s26 + $0x188] ss:$24 sps:$4 sm:$0xff]  }
 0x1ca   : > { %1605 = vmatprep.subr.bf16.mxu1 %v4395_v14  ;;  %1561 = vmatpush1.bf16.msra.mxu0 %v4400_v16  ;;  %v4430_v37 = vld [vmem:[%s5894_s26 + $0x150] ss:$24 sps:$4 sm:$0xff]   ;;  %v4433_v38 = vld [vmem:[%s5894_s26 + $0x184] ss:$24 sps:$4 sm:$0xff]   ;;  %v4436_v40 = vld [vmem:[%s5894_s26 + $0x180] ss:$24 sps:$4 sm:$0xff]  }
 0x1cb   : > { %1562 = vmatprep.subr.bf16.mxu0 %v4403_v18  ;;  %v4431_v39 = vld [vmem:[%s5894_s26 + $0x1bc] ss:$24 sps:$4 sm:$0xff]   ;;  %v4435_v41 = vld [vmem:[%s5894_s26 + $0x1b8] ss:$24 sps:$4 sm:$0xff]   ;;  %v4437_v43 = vld [vmem:[%s5894_s26 + $0x1ec] ss:$24 sps:$4 sm:$0xff]  }
 0x1cc   : > { %v4439_v42 = vld [vmem:[%s5894_s26 + $0x1b4] ss:$24 sps:$4 sm:$0xff]   ;;  %v4441_v44 = vld [vmem:[%s5894_s26 + $0x1e8] ss:$24 sps:$4 sm:$0xff]   ;;  %v4445_v46 = vld [vmem:[%s5894_s26 + $0x1e4] ss:$24 sps:$4 sm:$0xff]  }
 0x1cd   : > { %1606 = vmatpush1.bf16.msra.mxu1 %v4399_v17  ;;  %v4442_v45 = vld [vmem:[%s5894_s26 + $0x1b0] ss:$24 sps:$4 sm:$0xff]   ;;  %v4443_v47 = vld [vmem:[%s5894_s26 + $0x21c] ss:$24 sps:$4 sm:$0xff]   ;;  %v4448_v50 = vld [vmem:[%s5894_s26 + $0x1e0] ss:$24 sps:$4 sm:$0xff]  }
 0x1ce   : > { %1607 = vmatprep.subr.bf16.mxu1 %v4401_v19  ;;  %1563 = vmatpush1.bf16.msra.mxu0 %v4406_v21  ;;  %v943_v48 = vld [vmem:[#allocation19 + $0x8] sm:$0xff]  ;;  %v945_v49 = vld [vmem:[#allocation19 + $0x18] sm:$0xff]  ;;  %v942_v5 = vld [vmem:[#allocation19] sm:$0xff]  ;;  %vm5320_vm0 = vmmov 0   ;;  %vm1821_vm1 = vcmask 1043456   ;;  %vm1793_vm3 = vcmask 64512  }
 0x1cf   : > { %1564 = vmatprep.subr.bf16.mxu0 %v4409_v22  ;;  %v947_v51 = vpack.c.bf16 %v945_v49, %v943_v48  ;;  %v4447_v52 = vld [vmem:[%s5894_s26 + $0x218] ss:$24 sps:$4 sm:$0xff]   ;;  %v4451_v53 = vld [vmem:[%s5894_s26 + $0x214] ss:$24 sps:$4 sm:$0xff]   ;;  %v4453_v56 = vld [vmem:[%s5894_s26 + $0x248] ss:$24 sps:$4 sm:$0xff]  }
 0x1d0   : > { %v4449_v54 = vld [vmem:[%s5894_s26 + $0x24c] ss:$24 sps:$4 sm:$0xff]   ;;  %v4454_v55 = vld [vmem:[%s5894_s26 + $0x210] ss:$24 sps:$4 sm:$0xff]   ;;  %v4455_v58 = vld [vmem:[%s5894_s26 + $0x27c] ss:$24 sps:$4 sm:$0xff]  }
 0x1d1   : > { %1608 = vmatpush1.bf16.msra.mxu1 %v4405_v20  ;;  %1631 = vmatprep.mubr.bf16.mxu1 %v947_v51  ;;  %v4457_v57 = vld [vmem:[%s5894_s26 + $0x244] ss:$24 sps:$4 sm:$0xff]   ;;  %v4460_v59 = vld [vmem:[%s5894_s26 + $0x240] ss:$24 sps:$4 sm:$0xff]   ;;  %v4463_v61 = vld [vmem:[%s5894_s26 + $0x274] ss:$24 sps:$4 sm:$0xff]  }
 0x1d2   : > { %1609 = vmatprep.subr.bf16.mxu1 %v4407_v23  ;;  %1565 = vmatpush1.bf16.msra.mxu0 %v4412_v24  ;;  %v4459_v60 = vld [vmem:[%s5894_s26 + $0x278] ss:$24 sps:$4 sm:$0xff]   ;;  %v4461_v62 = vld [vmem:[%s5894_s26 + $0x2ac] ss:$24 sps:$4 sm:$0xff]   ;;  %v4465_v0 = vld [vmem:[%s5894_s26 + $0x2a8] ss:$24 sps:$4 sm:$0xff]  }
 0x1d3   : > { %1566 = vmatprep.subr.bf16.mxu0 %v4415_v26  ;;  %1588 = vmatprep.mubr.bf16.mxu0 %v947_v51  ;;  %v4466_v63 = vld [vmem:[%s5894_s26 + $0x270] ss:$24 sps:$4 sm:$0xff]   ;;  %v4469_v1 = vld [vmem:[%s5894_s26 + $0x2a4] ss:$24 sps:$4 sm:$0xff]   ;;  %v4472_v4 = vld [vmem:[%s5894_s26 + $0x2a0] ss:$24 sps:$4 sm:$0xff]  }
 0x1d4   : > { %v4467_v2 = vld [vmem:[%s5894_s26 + $0x2dc] ss:$24 sps:$4 sm:$0xff]   ;;  %v4471_v3 = vld [vmem:[%s5894_s26 + $0x2d8] ss:$24 sps:$4 sm:$0xff]   ;;  %s6483_s14 = sld [smem:[#allocation28_spill]] }
 0x1d5   : > { %1610 = vmatpush1.bf16.msra.mxu1 %v4411_v25  ;;  %v944_v6 = vld [vmem:[#allocation19 + $0x10] sm:$0xff]  ;;  %v4473_v7 = vld [vmem:[%s5894_s26 + $0x2d4] ss:$24 sps:$4 sm:$0xff]   ;;  %v4475_v9 = vld [vmem:[%s5894_s26 + $0x2d0] ss:$24 sps:$4 sm:$0xff]  }
 0x1d6   : > { %1611 = vmatprep.subr.bf16.mxu1 %v4413_v27  ;;  %1567 = vmatpush1.bf16.msra.mxu0 %v4418_v29  ;;  %v5982_v8 = vpack.c.bf16 %v944_v6, %v942_v5  ;;  %v4478_v10 = vld [vmem:[%s5894_s26 + $0x14] ss:$24 sps:$4 sm:$0xff]   ;;  %v4476_v11 = vld [vmem:[%s5894_s26 + $0x10] ss:$24 sps:$4 sm:$0xff]   ;;  %v4481_v12 = vld [vmem:[%s5894_s26 + $0x44] ss:$24 sps:$4 sm:$0xff]  }
 0x1d7   : > { %1568 = vmatprep.subr.bf16.mxu0 %v4421_v30  ;;  %v4479_v13 = vld [vmem:[%s5894_s26 + $0x40] ss:$24 sps:$4 sm:$0xff]   ;;  %v4484_v14 = vld [vmem:[%s5894_s26 + $0x74] ss:$24 sps:$4 sm:$0xff]   ;;  %v4482_v15 = vld [vmem:[%s5894_s26 + $0x70] ss:$24 sps:$4 sm:$0xff]  }
 0x1d8   : > { %v4487_v16 = vld [vmem:[%s5894_s26 + $0xa4] ss:$24 sps:$4 sm:$0xff]   ;;  %v4485_v17 = vld [vmem:[%s5894_s26 + $0xa0] ss:$24 sps:$4 sm:$0xff]   ;;  %v4490_v18 = vld [vmem:[%s5894_s26 + $0xd4] ss:$24 sps:$4 sm:$0xff]  }
 0x1d9   : > { %1612 = vmatpush1.bf16.msra.mxu1 %v4417_v28  ;;  %v4488_v19 = vld [vmem:[%s5894_s26 + $0xd0] ss:$24 sps:$4 sm:$0xff]   ;;  %v4493_v20 = vld [vmem:[%s5894_s26 + $0x104] ss:$24 sps:$4 sm:$0xff]   ;;  %v4491_v21 = vld [vmem:[%s5894_s26 + $0x100] ss:$24 sps:$4 sm:$0xff]  }
 0x1da   : > { %1613 = vmatprep.subr.bf16.mxu1 %v4419_v31  ;;  %1569 = vmatpush1.bf16.msra.mxu0 %v4424_v32  ;;  %v4496_v22 = vld [vmem:[%s5894_s26 + $0x134] ss:$24 sps:$4 sm:$0xff]   ;;  %v4494_v23 = vld [vmem:[%s5894_s26 + $0x130] ss:$24 sps:$4 sm:$0xff]   ;;  %v4499_v24 = vld [vmem:[%s5894_s26 + $0x164] ss:$24 sps:$4 sm:$0xff]  }
 0x1db   : > { %1570 = vmatprep.subr.bf16.mxu0 %v4427_v34  ;;  %v4497_v25 = vld [vmem:[%s5894_s26 + $0x160] ss:$24 sps:$4 sm:$0xff]   ;;  %v4502_v26 = vld [vmem:[%s5894_s26 + $0x194] ss:$24 sps:$4 sm:$0xff]   ;;  %v4500_v27 = vld [vmem:[%s5894_s26 + $0x190] ss:$24 sps:$4 sm:$0xff]  }
 0x1dc   : > { %v4505_v28 = vld [vmem:[%s5894_s26 + $0x1c4] ss:$24 sps:$4 sm:$0xff]   ;;  %v4503_v29 = vld [vmem:[%s5894_s26 + $0x1c0] ss:$24 sps:$4 sm:$0xff]   ;;  %v4508_v30 = vld [vmem:[%s5894_s26 + $0x1f4] ss:$24 sps:$4 sm:$0xff]  }
 0x1dd   : > { %1614 = vmatpush1.bf16.msra.mxu1 %v4423_v33  ;;  %v4506_v31 = vld [vmem:[%s5894_s26 + $0x1f0] ss:$24 sps:$4 sm:$0xff]   ;;  %v4511_v32 = vld [vmem:[%s5894_s26 + $0x224] ss:$24 sps:$4 sm:$0xff]   ;;  %v4509_v33 = vld [vmem:[%s5894_s26 + $0x220] ss:$24 sps:$4 sm:$0xff]  }
 0x1de   : > { %1615 = vmatprep.subr.bf16.mxu1 %v4425_v35  ;;  %1571 = vmatpush1.bf16.msra.mxu0 %v4430_v37  ;;  %v4514_v34 = vld [vmem:[%s5894_s26 + $0x254] ss:$24 sps:$4 sm:$0xff]   ;;  %v4512_v35 = vld [vmem:[%s5894_s26 + $0x250] ss:$24 sps:$4 sm:$0xff]   ;;  %v4515_v37 = vld [vmem:[%s5894_s26 + $0x280] ss:$24 sps:$4 sm:$0xff]  }
 0x1df   : > { %1572 = vmatprep.subr.bf16.mxu0 %v4433_v38  ;;  %v4520_v38 = vld [vmem:[%s5894_s26 + $0x2b4] ss:$24 sps:$4 sm:$0xff]   ;;  %p4316_p5 = scmp.eq.s32.totalorder %s6483_s14, 1 }
 0x1e1   : > { %1616 = vmatpush1.bf16.msra.mxu1 %v4429_v36  ;;  %v4517_v36 = vld [vmem:[%s5894_s26 + $0x284] ss:$24 sps:$4 sm:$0xff]  }
 0x1e2   : > { %1617 = vmatprep.subr.bf16.mxu1 %v4431_v39  ;;  %1573 = vmatpush1.bf16.msra.mxu0 %v4436_v40  ;;  %v4518_v39 = vld [vmem:[%s5894_s26 + $0x2b0] ss:$24 sps:$4 sm:$0xff]   ;;  %v4523_v40 = vld [vmem:[%s5894_s26 + $0x2e4] ss:$24 sps:$4 sm:$0xff]  }
 0x1e3   : > { %1574 = vmatprep.subr.bf16.mxu0 %v4439_v42  ;;  %v5319_v42 = vmov 0.0  }
 0x1e5   : > { %1618 = vmatpush1.bf16.msra.mxu1 %v4435_v41  ;;  %v4521_v41 = vld [vmem:[%s5894_s26 + $0x2e0] ss:$24 sps:$4 sm:$0xff]   ;;  %s5321_s26 = smov [#allocation19]  }
 0x1e6   : > { %1619 = vmatprep.subr.bf16.mxu1 %v4437_v43  ;;  %1575 = vmatpush1.bf16.msra.mxu0 %v4442_v45  ;;  %v1046_v43 = vlaneseq  ;;  %s3515_s18 = sshll.u32 %s5321_s26, 4  ;;  %s3516_s18 = int_to_ptr.vmem [resolvable:$true] %s3515_s18 }
 0x1e7   : > { %1576 = vmatprep.subr.bf16.mxu0 %v4445_v46  ;;  %v1044_v46 = vld [vmem:[%s5902_s2] sm:$0x3f]  ;;  %s5208_s1 = scalar_lea.vmem %s3516_s18, 512  ;;  %p5215_p11 = scmp.lt.s32.totalorder %s3516_s18, %s3516_s18 }
 0x1e8   : > { %p5209_p1 = scmp.ne.s32.totalorder %s3516_s18, %s5208_s1  ;;  %p5216_p2 = scmp.lt.s32.totalorder %s5208_s1, %s5208_s1 }
 0x1e9   : > { %1620 = vmatpush1.bf16.msra.mxu1 %v4441_v44  ;;  %v6027_v44 = vshrl.u32 %v1046_v43, 7 }
 0x1ea   : > { %1621 = vmatprep.subr.bf16.mxu1 %v4443_v47  ;;  %1577 = vmatpush1.bf16.msra.mxu0 %v4448_v50  ;;  %p5210_p8 = pnand %p5209_p1, %p4316_p5  ;;  %p5217_p12 = por %p5216_p2, %p5215_p11 }
 0x1eb   : > { %1578 = vmatprep.subr.bf16.mxu0 %v4451_v53  ;;  %v1056_v45 = vsub.s32 2, %v6027_v44  ;;  %v1060_v47 = vsub.s32 3, %v6027_v44  ;;  %v6033_v48 = vsub.s32 0, %v6027_v44  ;;  %v6038_v50 = vsub.s32 1, %v6027_v44 }
 0x1ec   : > { %p5211_p10 = pneg %p5210_p8 }
 0x1ed   : > { %1622 = vmatpush1.bf16.msra.mxu1 %v4447_v52  ;;  %v1057_v49 = vrot.slane %v1044_v46, %v1056_v45  ;;  %v1049_v53 = vrot.slane %v1044_v46, %v6033_v48 }
 0x1ee   : > { %1623 = vmatprep.subr.bf16.mxu1 %v4449_v54  ;;  %1579 = vmatpush1.bf16.msra.mxu0 %v4454_v55  ;;  %p5218_p9 = pnand %p5217_p12, %p5211_p10 }
 0x1ef   : > { %1580 = vmatprep.subr.bf16.mxu0 %v4457_v57 }
 0x1f1   : > { %1624 = vmatpush1.bf16.msra.mxu1 %v4453_v56  ;;  %v1053_v56 = vrot.slane %v1044_v46, %v6038_v50 }
 0x1f2   : > { %1625 = vmatprep.subr.bf16.mxu1 %v4455_v58  ;;  %1581 = vmatpush1.bf16.msra.mxu0 %v4460_v59 }
 0x1f3   : > { %1582 = vmatprep.subr.bf16.mxu0 %v4463_v61 }
 0x1f5   : > { %1626 = vmatpush1.bf16.msra.mxu1 %v4459_v60 }
 0x1f6   : > { %1627 = vmatprep.subr.bf16.mxu1 %v4461_v62  ;;  %1583 = vmatpush1.bf16.msra.mxu0 %v4466_v63 }
 0x1f7   : > { %1584 = vmatprep.subr.bf16.mxu0 %v4469_v1 }
 0x1f9   : > { %1628 = vmatpush1.bf16.msra.mxu1 %v4465_v0 }
 0x1fa   : > { %1629 = vmatprep.subr.bf16.mxu1 %v4467_v2  ;;  %1585 = vmatpush1.bf16.msra.mxu0 %v4472_v4 }
 0x1fb   : > { %1586 = vmatprep.subr.bf16.mxu0 %v4473_v7 }
 0x1fd   : > { %1630 = vmatpush1.bf16.msra.mxu1 %v4471_v3 }
 0x1fe   : > { %1587 = vmatpush1.bf16.msra.mxu0 %v4475_v9  ;;  %4193 = vmatprep.subr.bf16.mxu1 %v5319_v42 }
 0x1ff   : > { %1642 = vmatprep.subr.bf16.mxu0 %v4478_v10 }
 0x200   : > { %1632 = vmatmul.mubr.bf16.vlgmr.msra.gmra.mrb[0].mxu1 %v5982_v8 }
 0x201   : > { %1589 = vmatmul.mubr.bf16.vlgmr.msra.gmra.mrb[0].mxu0 %v5982_v8  ;;  %4195 = vmatprep.mubr.msk.bf16.mxu1 %vm5320_vm0, %v5319_v42 }
 0x202   : > { %1643 = vmatpush1.bf16.msra.mxu0 %v4476_v11  ;;  %1674 = vmatprep.mubr.bf16.mxu0 %v947_v51  ;;  %v1061_v51 = vrot.slane %v1044_v46, %v1060_v47 }
 0x203   : > { %1644 = vmatprep.subr.bf16.mxu0 %v4481_v12 }
 0x206   : > { %1645 = vmatpush1.bf16.msra.mxu0 %v4479_v13 }
 0x207   : > { %1646 = vmatprep.subr.bf16.mxu0 %v4484_v14  ;;  %v1064_v14 = vsub.s32 4, %v6027_v44 }
 0x20a   : > { %1647 = vmatpush1.bf16.msra.mxu0 %v4482_v15  ;;  %v1068_v15 = vsub.s32 5, %v6027_v44 }
 0x20b   : > { %1648 = vmatprep.subr.bf16.mxu0 %v4487_v16  ;;  %v1065_v16 = vrot.slane %v1044_v46, %v1064_v14 }
 0x20e   : > { %1649 = vmatpush1.bf16.msra.mxu0 %v4485_v17  ;;  %v1069_v17 = vrot.slane %v1044_v46, %v1068_v15 }
 0x20f   : > { %1650 = vmatprep.subr.bf16.mxu0 %v4490_v18 }
 0x212   : > { %1651 = vmatpush1.bf16.msra.mxu0 %v4488_v19 }
 0x213   : > { %1652 = vmatprep.subr.bf16.mxu0 %v4493_v20 }
 0x216   : > { %1653 = vmatpush1.bf16.msra.mxu0 %v4491_v21 }
 0x217   : > { %1654 = vmatprep.subr.bf16.mxu0 %v4496_v22 }
 0x21a   : > { %1655 = vmatpush1.bf16.msra.mxu0 %v4494_v23 }
 0x21b   : > { %1656 = vmatprep.subr.bf16.mxu0 %v4499_v24 }
 0x21e   : > { %1657 = vmatpush1.bf16.msra.mxu0 %v4497_v25 }
 0x21f   : > { %1658 = vmatprep.subr.bf16.mxu0 %v4502_v26 }
 0x222   : > { %1659 = vmatpush1.bf16.msra.mxu0 %v4500_v27 }
 0x223   : > { %1660 = vmatprep.subr.bf16.mxu0 %v4505_v28 }
 0x226   : > { %1661 = vmatpush1.bf16.msra.mxu0 %v4503_v29 }
 0x227   : > { %1662 = vmatprep.subr.bf16.mxu0 %v4508_v30 }
 0x22a   : > { %1663 = vmatpush1.bf16.msra.mxu0 %v4506_v31 }
 0x22b   : > { %1664 = vmatprep.subr.bf16.mxu0 %v4511_v32 }
 0x22e   : > { %1665 = vmatpush1.bf16.msra.mxu0 %v4509_v33 }
 0x22f   : > { %1666 = vmatprep.subr.bf16.mxu0 %v4514_v34  ;;  %v1688_v34 = vand.u32 127, %v1046_v43 }
 0x231   : > { %vm1689_vm2 = vcmp.gt.s32.totalorder %v1688_v34, %v6027_v44 }
 0x232   : > { %1667 = vmatpush1.bf16.msra.mxu0 %v4512_v35  ;;  %v1690_v35 = vsel %vm1689_vm2, -1e+30, %v5319_v42 }
 0x233   : > { %1668 = vmatprep.subr.bf16.mxu0 %v4517_v36  ;;  %v3969_v36 = vld [vmem:[#allocation5] ss:$0 sm:$0xff] }
 0x236   : > { %1669 = vmatpush1.bf16.msra.mxu0 %v4515_v37  ;;  %v1705_v37 = vadd.f32 %v3969_v36, %v1690_v35 }
 0x237   : > { %1670 = vmatprep.subr.bf16.mxu0 %v4520_v38 }
 0x23a   : > { %1671 = vmatpush1.bf16.msra.mxu0 %v4518_v39 }
 0x23b   : > { %1672 = vmatprep.subr.bf16.mxu0 %v4523_v40 }
 0x23e   : > { %1673 = vmatpush1.bf16.msra.mxu0 %v4521_v41 }
 0x23f   : > { %4169 = vmatprep.subr.bf16.mxu0 %v5319_v42 }
 0x241   : > { %1675 = vmatmul.mubr.bf16.vlgmr.msra.gmra.mrb[4].mxu0 %v5982_v8 }
 0x242   : > { %4171 = vmatprep.mubr.msk.bf16.mxu0 %vm5320_vm0, %v5319_v42 }
 0x2d3   : > { %v1633_v52 = vpop.f32.mrb[0].mxu1 }
 0x2d4   : > { %v1634_v54 = vadd.f32 %v1633_v52, %v1057_v49  ;;  %v1635_v55 = vpop.f32.mrb[1].mxu1  ;;  %v1590_v61 = vpop.f32.mrb[0].mxu0 }
 0x2d5   : > { %v1636_v57 = vadd.f32 %v1635_v55, %v1061_v51  ;;  %v1637_v58 = vpop.f32.mrb[2].mxu1  ;;  %v1591_v63 = vadd.f32 %v1590_v61, %v1049_v53  ;;  %v1592_v0 = vpop.f32.mrb[1].mxu0 }
 0x2d6   : > { %v1709_v59 = vpack.c.bf16 %v1634_v54, %v1634_v54  ;;  %v1639_v60 = vpop.f32.mrb[3].mxu1  ;;  %v1593_v1 = vadd.f32 %v1592_v0, %v1053_v56  ;;  %v1594_v2 = vpop.f32.mrb[2].mxu0  ;;  %v1638_v4 = vadd.f32 %v1637_v58, %v1057_v49 }
 0x2d7   : > { %v1915_v62 = vpack.c.bf16 %v1636_v57, %v1636_v57  ;;  %v1596_v3 = vpop.f32.mrb[3].mxu0  ;;  %v1640_v5 = vadd.f32 %v1639_v60, %v1061_v51  ;;  %v1707_v6 = vpack.c.bf16 %v1591_v63, %v1591_v63  ;;  %v1595_v10 = vadd.f32 %v1594_v2, %v1049_v53  ;;  %v3970_v53 = vld [vmem:[#allocation5 + $0x1] ss:$0 sm:$0xff] }
 0x2d8   : > { %4170 = vmatpush3.bf16.xpose.msra.mxu0 %v1709_v59  ;;  %v1913_v7 = vpack.c.bf16 %v1593_v1, %v1593_v1  ;;  %v1710_v8 = vpack.c.bf16 %v1638_v4, %v1638_v4  ;;  %v1597_v11 = vadd.f32 %v1596_v3, %v1053_v56  ;;  %v1706_v56 = vadd.f32 %v3970_v53, %v1690_v35  ;;  %v4530_v53 = vld [vmem:[%s5904_s27 + $0x20] ss:$8 sps:$4 sm:$0xff]  }
 0x2d9   : > { %4194 = vmatpush3.bf16.xpose.msra.mxu1 %v1915_v62  ;;  %4175 = vmatprep.subr.bf16.mxu0 %v5319_v42  ;;  %v1916_v9 = vpack.c.bf16 %v1640_v5, %v1640_v5  ;;  %v1708_v12 = vpack.c.bf16 %v1595_v10, %v1595_v10 }
 0x2da   : > { %4199 = vmatprep.subr.bf16.mxu1 %v5319_v42  ;;  %v1914_v13 = vpack.c.bf16 %v1597_v11, %v1597_v11 }
 0x2df   : > { %4172 = vmatmul.mubr.bf16.vlgmr.msra.gmra.mrb[8].mxu0 %v1707_v6 }
 0x2e0   : > { %4176 = vmatpush3.bf16.xpose.msra.mxu0 %v1710_v8  ;;  %4196 = vmatmul.mubr.bf16.vlgmr.msra.gmra.mrb[4].mxu1 %v1913_v7 }
 0x2e1   : > { %4200 = vmatpush3.bf16.xpose.msra.mxu1 %v1916_v9  ;;  %4177 = vmatprep.mubr.msk.bf16.mxu0 %vm5320_vm0, %v5319_v42 }
 0x2e2   : > { %4201 = vmatprep.mubr.msk.bf16.mxu1 %vm5320_vm0, %v5319_v42  ;;  %4181 = vmatprep.subr.bf16.mxu0 %v5319_v42 }
 0x2e3   : > { %4205 = vmatprep.subr.bf16.mxu1 %v5319_v42 }
 0x2e7   : > { %4178 = vmatmul.mubr.bf16.vlgmr.msra.gmra.mrb[12].mxu0 %v1708_v12 }
 0x2e8   : > { %4202 = vmatmul.mubr.bf16.vlgmr.msra.gmra.mrb[8].mxu1 %v1914_v13  ;;  %4183 = vmatprep.mubr.msk.bf16.mxu0 %vm5320_vm0, %v5319_v42 }
 0x2e9   : > { %4207 = vmatprep.mubr.msk.bf16.mxu1 %vm5320_vm0, %v5319_v42 }
 0x314   : > { %v1676_v18 = vpop.f32.mrb[4].mxu0 }
 0x315   : > { %v1677_v19 = vadd.f32 %v1676_v18, %v1065_v16  ;;  %v1678_v20 = vpop.f32.mrb[5].mxu0 }
 0x316   : > { %v1679_v21 = vadd.f32 %v1678_v20, %v1069_v17  ;;  %v1680_v22 = vpop.f32.mrb[6].mxu0 }
 0x317   : > { %v1711_v23 = vpack.c.bf16 %v1677_v19, %v1677_v19  ;;  %v1681_v24 = vadd.f32 %v1680_v22, %v1065_v16  ;;  %v1682_v25 = vpop.f32.mrb[7].mxu0 }
 0x318   : > { %v1917_v26 = vpack.c.bf16 %v1679_v21, %v1679_v21  ;;  %v1683_v27 = vadd.f32 %v1682_v25, %v1069_v17 }
 0x319   : > { %v1823_v28 = vsel %vm1821_vm1, %v1711_v23, 0  ;;  %v1712_v29 = vpack.c.bf16 %v1681_v24, %v1681_v24 }
 0x31a   : > { %v2027_v30 = vsel %vm1821_vm1, %v1917_v26, 0  ;;  %v1918_v31 = vpack.c.bf16 %v1683_v27, %v1683_v27  ;;  %4182 = vmatpush3.bf16.msra.mxu0 %v1823_v28 }
 0x31b   : > { %v6061_v32 = vsel %vm1821_vm1, %v1712_v29, 0  ;;  %4206 = vmatpush3.bf16.msra.mxu1 %v2027_v30  ;;  %4187 = vmatprep.subr.bf16.mxu0 %v5319_v42 }
 0x31c   : > { %v6065_v33 = vsel %vm1821_vm1, %v1918_v31, 0  ;;  %4211 = vmatprep.subr.bf16.mxu1 %v5319_v42 }
 0x3b2   : > { %v1747_v38 = vpop.f32.mrb[8].mxu0 }
 0x3b3   : > { %v4173_v39 = vpop.f32.mrb[9].mxu0  ;;  %v1953_v40 = vpop.f32.mrb[4].mxu1  ;;  %v1748_v54 = vadd.f32 %v1747_v38, %v1705_v37  ;;  %v4526_v38 = vld [vmem:[%s5904_s27 + $0x4] ss:$8 sps:$4 sm:$0xff]  }
 0x3b4   : > { %v1954_v41 = vadd.f32 %v1953_v40, %v1705_v37  ;;  %v1750_v46 = vpop.f32.mrb[10].mxu0  ;;  %v4197_v49 = vpop.f32.mrb[5].mxu1 }
 0x3b5   : > { %v4174_v51 = vpop.f32.mrb[11].mxu0  ;;  %v1956_v52 = vpop.f32.mrb[6].mxu1  ;;  %v1794_v58 = vsel %vm1793_vm3, %v1748_v54, -inf  ;;  %v4524_v49 = vld [vmem:[%s5904_s27] ss:$8 sps:$4 sm:$0xff]  }
 0x3b6   : > { %v4198_v55 = vpop.f32.mrb[7].mxu1  ;;  %v1999_v43 = vsel %vm1793_vm3, %v1954_v41, -inf  ;;  %v4529_v52 = vld [vmem:[%s5904_s27 + $0x14] ss:$8 sps:$4 sm:$0xff]  }
 0x3b7   : > { %2000 = vmax.xlane.f32.xlu0 %v1999_v43  ;;  %v4533_v55 = vld [vmem:[%s5904_s27 + $0x30] ss:$8 sps:$4 sm:$0xff]   ;;  %v4538_v43 = vld [vmem:[%s5904_s27 + $0x44] ss:$8 sps:$4 sm:$0xff]  }
 0x3ba   : > { %v1787_v57 = vpop.f32.mrb[12].mxu0 }
 0x3bb   : > { %v1993_v59 = vpop.f32.mrb[8].mxu1  ;;  %1795 = vmax.xlane.f32.xlu0 %v1794_v58  ;;  %v4179_v60 = vpop.f32.mrb[13].mxu0  ;;  %v1788_v2 = vadd.f32 %v1787_v57, %v1706_v56  ;;  %v4541_v57 = vld [vmem:[%s5904_s27 + $0x54] ss:$8 sps:$4 sm:$0xff]   ;;  %v4539_v58 = vld [vmem:[%s5904_s27 + $0x50] ss:$8 sps:$4 sm:$0xff]  }
 0x3bc   : > { %v1994_v61 = vadd.f32 %v1993_v59, %v1706_v56  ;;  %v1790_v62 = vpop.f32.mrb[14].mxu0  ;;  %v4203_v63 = vpop.f32.mrb[9].mxu1  ;;  %v4536_v56 = vld [vmem:[%s5904_s27 + $0x40] ss:$8 sps:$4 sm:$0xff]   ;;  %v4544_v59 = vld [vmem:[%s5904_s27 + $0x64] ss:$8 sps:$4 sm:$0xff]  }
 0x3bd   : > { %v4180_v0 = vpop.f32.mrb[15].mxu0  ;;  %v1996_v1 = vpop.f32.mrb[10].mxu1  ;;  %v1797_v5 = vsel %vm1793_vm3, %v1788_v2, -inf  ;;  %v4542_v60 = vld [vmem:[%s5904_s27 + $0x60] ss:$8 sps:$4 sm:$0xff]  }
 0x3be   : > { %v4204_v3 = vpop.f32.mrb[11].mxu1  ;;  %v2002_v4 = vsel %vm1793_vm3, %v1994_v61, -inf  ;;  %v4545_v62 = vld [vmem:[%s5904_s27 + $0x70] ss:$8 sps:$4 sm:$0xff]   ;;  %v4550_v63 = vld [vmem:[%s5904_s27 + $0x84] ss:$8 sps:$4 sm:$0xff]  }
 0x3bf   : > { %2003 = vmax.xlane.f32.xlu1 %v2002_v4  ;;  %v4548_v0 = vld [vmem:[%s5904_s27 + $0x80] ss:$8 sps:$4 sm:$0xff]   ;;  %v4553_v1 = vld [vmem:[%s5904_s27 + $0x94] ss:$8 sps:$4 sm:$0xff]   ;;  %v4556_v3 = vld [vmem:[%s5904_s27 + $0xa4] ss:$8 sps:$4 sm:$0xff]  }
 0x3c0   : > { %v4554_v4 = vld [vmem:[%s5904_s27 + $0xa0] ss:$8 sps:$4 sm:$0xff]  }
 0x3c3   : > { %1798 = vmax.xlane.f32.xlu1 %v1797_v5  ;;  %v4559_v5 = vld [vmem:[%s5904_s27 + $0xb4] ss:$8 sps:$4 sm:$0xff]  }
 0x444   : > { %v2001_v6 = vpop.xlane.xlu0 %2000 }
 0x445   : > { %v2005_v7 = vsub.f32 %v1954_v41, %v2001_v6  ;;  %v4557_v6 = vld [vmem:[%s5904_s27 + $0xb0] ss:$8 sps:$4 sm:$0xff]  }
 0x447   : > { %v2007_v8 = vmul.f32 1.442695, %v2005_v7  ;;  %v4562_v7 = vld [vmem:[%s5904_s27 + $0xc4] ss:$8 sps:$4 sm:$0xff]  }
 0x448   : > { %v1796_v9 = vpop.xlane.xlu0 %1795 }
 0x449   : > { %4764 = vpow2.f32 %v2007_v8  ;;  %v1800_v10 = vsub.f32 %v1748_v54, %v1796_v9  ;;  %v4535_v54 = vld [vmem:[%s5904_s27 + $0x34] ss:$8 sps:$4 sm:$0xff]   ;;  %v4560_v8 = vld [vmem:[%s5904_s27 + $0xc0] ss:$8 sps:$4 sm:$0xff]  }
 0x44a   : > { %v4565_v9 = vld [vmem:[%s5904_s27 + $0xd4] ss:$8 sps:$4 sm:$0xff]  }
 0x44b   : > { %v1802_v11 = vmul.f32 1.442695, %v1800_v10  ;;  %v4563_v10 = vld [vmem:[%s5904_s27 + $0xd0] ss:$8 sps:$4 sm:$0xff]  }
 0x44c   : > { %v2004_v12 = vpop.xlane.xlu1 %2003 }
 0x44d   : > { %4766 = vpow2.f32 %v1802_v11  ;;  %v2006_v13 = vsub.f32 %v1994_v61, %v2004_v12  ;;  %v4547_v61 = vld [vmem:[%s5904_s27 + $0x74] ss:$8 sps:$4 sm:$0xff]   ;;  %v4568_v11 = vld [vmem:[%s5904_s27 + $0xe4] ss:$8 sps:$4 sm:$0xff]   ;;  %v4566_v12 = vld [vmem:[%s5904_s27 + $0xe0] ss:$8 sps:$4 sm:$0xff]  }
 0x44f   : > { %v2009_v14 = vmul.f32 1.442695, %v2006_v13  ;;  %v4571_v13 = vld [vmem:[%s5904_s27 + $0xf4] ss:$8 sps:$4 sm:$0xff]  }
 0x450   : > { %v1799_v15 = vpop.xlane.xlu1 %1798 }
 0x451   : > { %4768 = vpow2.f32 %v2009_v14  ;;  %v1801_v16 = vsub.f32 %v1788_v2, %v1799_v15  ;;  %v4551_v2 = vld [vmem:[%s5904_s27 + $0x90] ss:$8 sps:$4 sm:$0xff]  }
 0x452   : > { %v4569_v14 = vld [vmem:[%s5904_s27 + $0xf0] ss:$8 sps:$4 sm:$0xff]  }
 0x453   : > { %v4765_v17 = vpop.eup %4764  ;;  %v1804_v18 = vmul.f32 1.442695, %v1801_v16 }
 0x454   : > { %v2011_v19 = vsel %vm1793_vm3, %v4765_v17, 0.0 }
 0x455   : > { %4770 = vpow2.f32 %v1804_v18  ;;  %2012 = vadd.xlane.f32.xlu0 %v2011_v19 }
 0x457   : > { %v4767_v20 = vpop.eup %4766 }
 0x458   : > { %v1806_v21 = vsel %vm1793_vm3, %v4767_v20, 0.0 }
 0x459   : > { %1807 = vadd.xlane.f32.xlu1 %v1806_v21 }
 0x45b   : > { %v4769_v22 = vpop.eup %4768 }
 0x45c   : > { %v2014_v23 = vsel %vm1793_vm3, %v4769_v22, 0.0 }
 0x45d   : > { %2015 = vadd.xlane.f32.xlu0 %v2014_v23 }
 0x45f   : > { %v4771_v24 = vpop.eup %4770 }
 0x460   : > { %v1809_v25 = vsel %vm1793_vm3, %v4771_v24, 0.0 }
 0x461   : > { %1810 = vadd.xlane.f32.xlu1 %v1809_v25 }
 0x4e2   : > { %v2013_v26 = vpop.xlane.xlu0 %2012 }
 0x4e3   : > { %4772 = vrcp.f32 %v2013_v26 }
 0x4e6   : > { %v1808_v27 = vpop.xlane.xlu1 %1807 }
 0x4e7   : > { %4774 = vrcp.f32 %v1808_v27 }
 0x4ea   : > { %v2016_v28 = vpop.xlane.xlu0 %2015 }
 0x4eb   : > { %4776 = vrcp.f32 %v2016_v28 }
 0x4ed   : > { %v4773_v29 = vpop.eup %4772 }
 0x4ee   : > { %v2019_v30 = vmul.f32 %v4773_v29, %v4765_v17  ;;  %v1811_v31 = vpop.xlane.xlu1 %1810 }
 0x4ef   : > { %4778 = vrcp.f32 %v1811_v31 }
 0x4f0   : > { %v2021_v34 = vpack.c.bf16 %v2019_v30, %v2019_v30 }
 0x4f1   : > { %v4775_v35 = vpop.eup %4774 }
 0x4f2   : > { %v1814_v36 = vmul.f32 %v4775_v35, %v4767_v20  ;;  %4208 = vmatmul.mubr.msk.bf16.vlgmr.msra.gmra.mrb[12].mxu1 %vm1793_vm3, %v2021_v34  ;;  %v2157_v35 = vld [vmem:[%s759_s22] sm:$0x3] }
 0x4f3   : > { %4212 = vmatpush3.bf16.msra.mxu1 %v6065_v33  ;;  %4213 = vmatprep.mubr.msk.bf16.mxu1 %vm5320_vm0, %v5319_v42 }
 0x4f4   : > { %v1816_v37 = vpack.c.bf16 %v1814_v36, %v1814_v36  ;;  %v2162_v36 = vrot.slane %v2157_v35, %v6033_v48 }
 0x4f5   : > { %v4777_v39 = vpop.eup %4776 }
 0x4f6   : > { %v2020_v40 = vmul.f32 %v4777_v39, %v4769_v22  ;;  %4184 = vmatmul.mubr.msk.bf16.vlgmr.msra.gmra.mrb[16].mxu0 %vm1793_vm3, %v1816_v37  ;;  %v2166_v37 = vrot.slane %v2157_v35, %v6038_v50  ;;  %v4626_v35 = vld [vmem:[%s5909_s24 + $0x120] ss:$16 sps:$4 sm:$0xff]  }
 0x4f7   : > { %4188 = vmatpush3.bf16.msra.mxu0 %v6061_v32  ;;  %4189 = vmatprep.mubr.msk.bf16.mxu0 %vm5320_vm0, %v5319_v42  ;;  %v4527_v32 = vld [vmem:[%s5904_s27 + $0x10] ss:$8 sps:$4 sm:$0xff]   ;;  %v4532_v42 = vld [vmem:[%s5904_s27 + $0x24] ss:$8 sps:$4 sm:$0xff]  }
 0x4f8   : > { %v2022_v41 = vpack.c.bf16 %v2020_v40, %v2020_v40  ;;  %2333 = vmatprep.subr.bf16.mxu0 %v4526_v38 }
 0x4f9   : > { %v4779_v33 = vpop.eup %4778 }
 0x4fa   : > { %v1815_v46 = vmul.f32 %v4779_v33, %v4771_v24  ;;  %4214 = vmatmul.mubr.msk.bf16.vlgmr.msra.gmra.mrb[16].mxu1 %vm1793_vm3, %v2022_v41 }
 0x4fc   : > { %v1817_v51 = vpack.c.bf16 %v1815_v46, %v1815_v46  ;;  %v4788_v46 = vld [vmem:[#allocation19] sm:$0xff] }
 0x4fe   : > { %4190 = vmatmul.mubr.msk.bf16.vlgmr.msra.gmra.mrb[20].mxu0 %vm1793_vm3, %v1817_v51 }
 0x4ff   : > { %2334 = vmatpush1.bf16.msra.mxu0 %v4524_v49 }
 0x500   : > { %2335 = vmatprep.subr.bf16.mxu0 %v4529_v52 }
 0x503   : > { %2336 = vmatpush1.bf16.msra.mxu0 %v4527_v32  ;;  %v4789_v32 = vld [vmem:[#allocation19 + $0x8] sm:$0xff] }
 0x504   : > { %2337 = vmatprep.subr.bf16.mxu0 %v4532_v42 }
 0x507   : > { %2338 = vmatpush1.bf16.msra.mxu0 %v4530_v53 }
 0x508   : > { %2339 = vmatprep.subr.bf16.mxu0 %v4535_v54  ;;  %v4790_v54 = vld [vmem:[#allocation19 + $0x10] sm:$0xff] }
 0x50b   : > { %2340 = vmatpush1.bf16.msra.mxu0 %v4533_v55 }
 0x50c   : > { %2341 = vmatprep.subr.bf16.mxu0 %v4538_v43  ;;  %v4791_v43 = vld [vmem:[#allocation19 + $0x18] sm:$0xff] }
 0x50f   : > { %2342 = vmatpush1.bf16.msra.mxu0 %v4536_v56 }
 0x510   : > { %2343 = vmatprep.subr.bf16.mxu0 %v4541_v57 }
 0x513   : > { %2344 = vmatpush1.bf16.msra.mxu0 %v4539_v58 }
 0x514   : > { %2345 = vmatprep.subr.bf16.mxu0 %v4544_v59  ;;  %v4572_v59 = vld [vmem:[%s5909_s24] ss:$16 sps:$4 sm:$0xff]  }
 0x517   : > { %2346 = vmatpush1.bf16.msra.mxu0 %v4542_v60  ;;  %v4574_v60 = vld [vmem:[%s5909_s24 + $0x4] ss:$16 sps:$4 sm:$0xff]  }
 0x518   : > { %2347 = vmatprep.subr.bf16.mxu0 %v4547_v61  ;;  %v4575_v61 = vld [vmem:[%s5909_s24 + $0x8] ss:$16 sps:$4 sm:$0xff]   ;;  %2853 = vmatprep.subr.bf16.mxu1 %v4574_v60  ;;  %v4638_v60 = vld [vmem:[%s5909_s24 + $0x160] ss:$16 sps:$4 sm:$0xff]  }
 0x519   : > { %2854 = vmatpush1.bf16.msra.mxu1 %v4572_v59  ;;  %v4643_v59 = vld [vmem:[%s5909_s24 + $0x16c] ss:$16 sps:$4 sm:$0xff]  }
 0x51b   : > { %2348 = vmatpush1.bf16.msra.mxu0 %v4545_v62  ;;  %v4577_v62 = vld [vmem:[%s5909_s24 + $0xc] ss:$16 sps:$4 sm:$0xff]  }
 0x51c   : > { %2349 = vmatprep.subr.bf16.mxu0 %v4550_v63  ;;  %v4580_v63 = vld [vmem:[%s5909_s24 + $0x24] ss:$16 sps:$4 sm:$0xff]  }
 0x51d   : > { %2855 = vmatprep.subr.bf16.mxu1 %v4580_v63  ;;  %v4649_v63 = vld [vmem:[%s5909_s24 + $0x18c] ss:$16 sps:$4 sm:$0xff]  }
 0x51f   : > { %2350 = vmatpush1.bf16.msra.mxu0 %v4548_v0  ;;  %v4583_v0 = vld [vmem:[%s5909_s24 + $0x2c] ss:$16 sps:$4 sm:$0xff]  }
 0x520   : > { %2351 = vmatprep.subr.bf16.mxu0 %v4553_v1  ;;  %v4578_v1 = vld [vmem:[%s5909_s24 + $0x20] ss:$16 sps:$4 sm:$0xff]  }
 0x521   : > { %2856 = vmatpush1.bf16.msra.mxu1 %v4578_v1  ;;  %v4647_v1 = vld [vmem:[%s5909_s24 + $0x188] ss:$16 sps:$4 sm:$0xff]  }
 0x523   : > { %2352 = vmatpush1.bf16.msra.mxu0 %v4551_v2  ;;  %v4581_v2 = vld [vmem:[%s5909_s24 + $0x28] ss:$16 sps:$4 sm:$0xff]  }
 0x524   : > { %2353 = vmatprep.subr.bf16.mxu0 %v4556_v3  ;;  %v4586_v3 = vld [vmem:[%s5909_s24 + $0x44] ss:$16 sps:$4 sm:$0xff]  }
 0x525   : > { %2857 = vmatprep.subr.bf16.mxu1 %v4586_v3  ;;  %v4655_v3 = vld [vmem:[%s5909_s24 + $0x1ac] ss:$16 sps:$4 sm:$0xff]  }
 0x527   : > { %2354 = vmatpush1.bf16.msra.mxu0 %v4554_v4  ;;  %v4589_v4 = vld [vmem:[%s5909_s24 + $0x4c] ss:$16 sps:$4 sm:$0xff]  }
 0x528   : > { %2355 = vmatprep.subr.bf16.mxu0 %v4559_v5  ;;  %v4584_v5 = vld [vmem:[%s5909_s24 + $0x40] ss:$16 sps:$4 sm:$0xff]  }
 0x529   : > { %2858 = vmatpush1.bf16.msra.mxu1 %v4584_v5  ;;  %v4653_v5 = vld [vmem:[%s5909_s24 + $0x1a8] ss:$16 sps:$4 sm:$0xff]  }
 0x52b   : > { %2356 = vmatpush1.bf16.msra.mxu0 %v4557_v6  ;;  %v4587_v6 = vld [vmem:[%s5909_s24 + $0x48] ss:$16 sps:$4 sm:$0xff]  }
 0x52c   : > { %2357 = vmatprep.subr.bf16.mxu0 %v4562_v7  ;;  %v4592_v7 = vld [vmem:[%s5909_s24 + $0x64] ss:$16 sps:$4 sm:$0xff]  }
 0x52d   : > { %2859 = vmatprep.subr.bf16.mxu1 %v4592_v7  ;;  %v4658_v7 = vld [vmem:[%s5909_s24 + $0x1c4] ss:$16 sps:$4 sm:$0xff]  }
 0x52f   : > { %2358 = vmatpush1.bf16.msra.mxu0 %v4560_v8  ;;  %v4595_v8 = vld [vmem:[%s5909_s24 + $0x6c] ss:$16 sps:$4 sm:$0xff]  }
 0x530   : > { %2359 = vmatprep.subr.bf16.mxu0 %v4565_v9  ;;  %v4590_v9 = vld [vmem:[%s5909_s24 + $0x60] ss:$16 sps:$4 sm:$0xff]  }
 0x531   : > { %2860 = vmatpush1.bf16.msra.mxu1 %v4590_v9  ;;  %v4661_v9 = vld [vmem:[%s5909_s24 + $0x1cc] ss:$16 sps:$4 sm:$0xff]  }
 0x533   : > { %2360 = vmatpush1.bf16.msra.mxu0 %v4563_v10  ;;  %v4593_v10 = vld [vmem:[%s5909_s24 + $0x68] ss:$16 sps:$4 sm:$0xff]  }
 0x534   : > { %2361 = vmatprep.subr.bf16.mxu0 %v4568_v11  ;;  %v4598_v11 = vld [vmem:[%s5909_s24 + $0x84] ss:$16 sps:$4 sm:$0xff]  }
 0x535   : > { %2861 = vmatprep.subr.bf16.mxu1 %v4598_v11  ;;  %v4667_v11 = vld [vmem:[%s5909_s24 + $0x1ec] ss:$16 sps:$4 sm:$0xff]  }
 0x537   : > { %2362 = vmatpush1.bf16.msra.mxu0 %v4566_v12  ;;  %v4601_v12 = vld [vmem:[%s5909_s24 + $0x8c] ss:$16 sps:$4 sm:$0xff]  }
 0x538   : > { %2363 = vmatprep.subr.bf16.mxu0 %v4571_v13  ;;  %v4596_v13 = vld [vmem:[%s5909_s24 + $0x80] ss:$16 sps:$4 sm:$0xff]  }
 0x539   : > { %2862 = vmatpush1.bf16.msra.mxu1 %v4596_v13  ;;  %v4665_v13 = vld [vmem:[%s5909_s24 + $0x1e8] ss:$16 sps:$4 sm:$0xff]  }
 0x53b   : > { %2364 = vmatpush1.bf16.msra.mxu0 %v4569_v14  ;;  %v4599_v14 = vld [vmem:[%s5909_s24 + $0x88] ss:$16 sps:$4 sm:$0xff]  }
 0x53c   : > { %2896 = vmatprep.subr.bf16.mxu0 %v4577_v62  ;;  %v4646_v62 = vld [vmem:[%s5909_s24 + $0x184] ss:$16 sps:$4 sm:$0xff]  }
 0x5c5   : > { %v2063_v15 = vpop.f32.mrb[12].mxu1 }
 0x5c6   : > { %v4209_v16 = vpop.f32.mrb[13].mxu1 }
 0x5c7   : > { %v2066_v17 = vpop.f32.mrb[14].mxu1  ;;  %v4607_v16 = vld [vmem:[%s5909_s24 + $0xac] ss:$16 sps:$4 sm:$0xff]  }
 0x5c8   : > { %v4210_v18 = vpop.f32.mrb[15].mxu1  ;;  %v4602_v17 = vld [vmem:[%s5909_s24 + $0xa0] ss:$16 sps:$4 sm:$0xff]  }
 0x5c9   : > { %v1859_v19 = vpop.f32.mrb[16].mxu0  ;;  %v4605_v18 = vld [vmem:[%s5909_s24 + $0xa8] ss:$16 sps:$4 sm:$0xff]  }
 0x5ca   : > { %v4185_v20 = vpop.f32.mrb[17].mxu0 }
 0x5cb   : > { %v1862_v21 = vpop.f32.mrb[18].mxu0  ;;  %v4613_v20 = vld [vmem:[%s5909_s24 + $0xcc] ss:$16 sps:$4 sm:$0xff]  }
 0x5cc   : > { %v4186_v22 = vpop.f32.mrb[19].mxu0  ;;  %v4608_v21 = vld [vmem:[%s5909_s24 + $0xc0] ss:$16 sps:$4 sm:$0xff]  }
 0x5cd   : > { %v2109_v23 = vpop.f32.mrb[16].mxu1  ;;  %v4611_v22 = vld [vmem:[%s5909_s24 + $0xc8] ss:$16 sps:$4 sm:$0xff]  }
 0x5ce   : > { %v4152_v24 = vpack.c.bf16 %v2109_v23, %v2063_v15  ;;  %v4215_v25 = vpop.f32.mrb[17].mxu1  ;;  %v4604_v15 = vld [vmem:[%s5909_s24 + $0xa4] ss:$16 sps:$4 sm:$0xff]  }
 0x5cf   : > { %v2112_v26 = vpop.f32.mrb[18].mxu1  ;;  %2863 = vmatprep.subr.bf16.mxu1 %v4604_v15  ;;  %v4616_v23 = vld [vmem:[%s5909_s24 + $0xe4] ss:$16 sps:$4 sm:$0xff]   ;;  %v4614_v25 = vld [vmem:[%s5909_s24 + $0xe0] ss:$16 sps:$4 sm:$0xff]  }
 0x5d0   : > { %v4216_v27 = vpop.f32.mrb[19].mxu1  ;;  %2365 = vmatprep.mubr.bf16.mxu0 %v4152_v24  ;;  %2864 = vmatpush1.bf16.msra.mxu1 %v4602_v17  ;;  %v4619_v24 = vld [vmem:[%s5909_s24 + $0xec] ss:$16 sps:$4 sm:$0xff]   ;;  %v4617_v26 = vld [vmem:[%s5909_s24 + $0xe8] ss:$16 sps:$4 sm:$0xff]  }
 0x5d1   : > { %v1905_v28 = vpop.f32.mrb[20].mxu0  ;;  %v4622_v27 = vld [vmem:[%s5909_s24 + $0x104] ss:$16 sps:$4 sm:$0xff]  }
 0x5d2   : > { %v4151_v29 = vpack.c.bf16 %v1905_v28, %v1859_v19  ;;  %v4191_v30 = vpop.f32.mrb[21].mxu0  ;;  %v4610_v19 = vld [vmem:[%s5909_s24 + $0xc4] ss:$16 sps:$4 sm:$0xff]   ;;  %v4625_v28 = vld [vmem:[%s5909_s24 + $0x10c] ss:$16 sps:$4 sm:$0xff]  }
 0x5d3   : > { %v1908_v31 = vpop.f32.mrb[22].mxu0  ;;  %2865 = vmatprep.subr.bf16.mxu1 %v4610_v19  ;;  %v4623_v30 = vld [vmem:[%s5909_s24 + $0x108] ss:$16 sps:$4 sm:$0xff]  }
 0x5d4   : > { %v4192_v34 = vpop.f32.mrb[23].mxu0  ;;  %2366 = vmatmul.mubr.bf16.vlgmr.msra.gmra.mrb[24].mxu0 %v4151_v29  ;;  %2866 = vmatpush1.bf16.msra.mxu1 %v4608_v21  ;;  %v4620_v29 = vld [vmem:[%s5909_s24 + $0x100] ss:$16 sps:$4 sm:$0xff]   ;;  %v4628_v31 = vld [vmem:[%s5909_s24 + $0x124] ss:$16 sps:$4 sm:$0xff]  }
 0x5d5   : > { %2897 = vmatpush1.bf16.msra.mxu0 %v4575_v61  ;;  %2867 = vmatprep.subr.bf16.mxu1 %v4616_v23  ;;  %v4631_v34 = vld [vmem:[%s5909_s24 + $0x12c] ss:$16 sps:$4 sm:$0xff]   ;;  %v4641_v61 = vld [vmem:[%s5909_s24 + $0x168] ss:$16 sps:$4 sm:$0xff]  }
 0x5d6   : > { %2898 = vmatprep.subr.bf16.mxu0 %v4583_v0  ;;  %v4644_v0 = vld [vmem:[%s5909_s24 + $0x180] ss:$16 sps:$4 sm:$0xff]   ;;  %v2380_v21 = vld [vmem:[%s768_s3] sm:$0x3] }
 0x5d7   : > { %v2419_v23 = vrot.slane %v2380_v21, %v6033_v48 }
 0x5d8   : > { %2868 = vmatpush1.bf16.msra.mxu1 %v4614_v25 }
 0x5d9   : > { %2899 = vmatpush1.bf16.msra.mxu0 %v4581_v2  ;;  %2869 = vmatprep.subr.bf16.mxu1 %v4622_v27  ;;  %v4652_v2 = vld [vmem:[%s5909_s24 + $0x1a4] ss:$16 sps:$4 sm:$0xff]  }
 0x5da   : > { %2900 = vmatprep.subr.bf16.mxu0 %v4589_v4  ;;  %v4650_v4 = vld [vmem:[%s5909_s24 + $0x1a0] ss:$16 sps:$4 sm:$0xff]  }
 0x5dc   : > { %2870 = vmatpush1.bf16.msra.mxu1 %v4620_v29 }
 0x5dd   : > { %2901 = vmatpush1.bf16.msra.mxu0 %v4587_v6  ;;  %2871 = vmatprep.subr.bf16.mxu1 %v4628_v31  ;;  %v4656_v6 = vld [vmem:[%s5909_s24 + $0x1c0] ss:$16 sps:$4 sm:$0xff]  }
 0x5de   : > { %2902 = vmatprep.subr.bf16.mxu0 %v4595_v8  ;;  %v4659_v8 = vld [vmem:[%s5909_s24 + $0x1c8] ss:$16 sps:$4 sm:$0xff]  }
 0x5e0   : > { %2872 = vmatpush1.bf16.msra.mxu1 %v4626_v35 }
 0x5e1   : > { %2903 = vmatpush1.bf16.msra.mxu0 %v4593_v10  ;;  %v4664_v10 = vld [vmem:[%s5909_s24 + $0x1e4] ss:$16 sps:$4 sm:$0xff]  }
 0x5e2   : > { %2904 = vmatprep.subr.bf16.mxu0 %v4601_v12  ;;  %v4662_v12 = vld [vmem:[%s5909_s24 + $0x1e0] ss:$16 sps:$4 sm:$0xff]  }
 0x5e5   : > { %2905 = vmatpush1.bf16.msra.mxu0 %v4599_v14  ;;  %v4670_v14 = vld [vmem:[%s5913_s25 + $0x4] ss:$8 sps:$4 sm:$0xff]  }
 0x5e6   : > { %2906 = vmatprep.subr.bf16.mxu0 %v4607_v16 }
 0x5e9   : > { %2907 = vmatpush1.bf16.msra.mxu0 %v4605_v18 }
 0x5ea   : > { %2908 = vmatprep.subr.bf16.mxu0 %v4613_v20 }
 0x5ed   : > { %2909 = vmatpush1.bf16.msra.mxu0 %v4611_v22  ;;  %v2381_v22 = vld [vmem:[%s777_s15] sm:$0x3] }
 0x5ee   : > { %2910 = vmatprep.subr.bf16.mxu0 %v4619_v24  ;;  %v2423_v24 = vrot.slane %v2380_v21, %v6038_v50  ;;  %v2434_v29 = vrot.slane %v2381_v22, %v6033_v48 }
 0x5f1   : > { %2911 = vmatpush1.bf16.msra.mxu0 %v4617_v26 }
 0x5f2   : > { %2912 = vmatprep.subr.bf16.mxu0 %v4625_v28 }
 0x5f5   : > { %2913 = vmatpush1.bf16.msra.mxu0 %v4623_v30  ;;  %v2438_v30 = vrot.slane %v2381_v22, %v6038_v50 }
 0x5f6   : > { %2914 = vmatprep.subr.bf16.mxu0 %v4631_v34 }
 0x6a7   : > { %v2367_v38 = vpop.f32.mrb[24].mxu0 }
 0x6a8   : > { %v2368_v39 = vadd.f32 %v2367_v38, %v2162_v36  ;;  %v2369_v40 = vpop.f32.mrb[25].mxu0 }
 0x6a9   : > { %v2370_v41 = vadd.f32 %v2369_v40, %v2166_v37  ;;  %v2371_v33 = vpop.f32.mrb[26].mxu0 }
 0x6aa   : > { %v6125_v49 = vadd.f32 %v4788_v46, %v2368_v39  ;;  %v2372_v51 = vadd.f32 %v2371_v33, %v2162_v36  ;;  %v2373_v52 = vpop.f32.mrb[27].mxu0  ;;  %v4629_v36 = vld [vmem:[%s5909_s24 + $0x128] ss:$16 sps:$4 sm:$0xff]  }
 0x6ab   : > { %v6127_v42 = vadd.f32 %v4789_v32, %v2370_v41  ;;  %v2374_v53 = vadd.f32 %v2373_v52, %v2166_v37  ;;  %2915 = vmatpush1.bf16.msra.mxu0 %v4629_v36 }
 0x6ac   : > { %v6129_v55 = vadd.f32 %v4790_v54, %v2372_v51 }
 0x6ad   : > { %v6131_v56 = vadd.f32 %v4791_v43, %v2374_v53  ;;  %v2382_v57 = vadd.f32 %v6127_v42, %v6125_v49  ;;  %v4637_v43 = vld [vmem:[%s5909_s24 + $0x14c] ss:$16 sps:$4 sm:$0xff]  }
 0x6ae   : > { %2916 = vmatprep.subr.bf16.mxu0 %v4637_v43  ;;  %v4682_v43 = vld [vmem:[%s5913_s25 + $0x44] ss:$8 sps:$4 sm:$0xff]  }
 0x6af   : > { %2383 = vadd.xlane.f32.xlu0 %v2382_v57  ;;  %v2385_v58 = vadd.f32 %v6131_v56, %v6129_v55  ;;  %v4635_v57 = vld [vmem:[%s5909_s24 + $0x148] ss:$16 sps:$4 sm:$0xff]  }
 0x6b0   : > { %2917 = vmatpush1.bf16.msra.mxu0 %v4635_v57  ;;  %v4685_v57 = vld [vmem:[%s5913_s25 + $0x54] ss:$8 sps:$4 sm:$0xff]  }
 0x6b1   : > { %2386 = vadd.xlane.f32.xlu1 %v2385_v58  ;;  %v4640_v58 = vld [vmem:[%s5909_s24 + $0x164] ss:$16 sps:$4 sm:$0xff]   ;;  %2918 = vmatprep.subr.bf16.mxu0 %v4643_v59 }
 0x6b2   : > { %v4688_v59 = vld [vmem:[%s5913_s25 + $0x64] ss:$8 sps:$4 sm:$0xff]  }
 0x6b4   : > { %2919 = vmatpush1.bf16.msra.mxu0 %v4641_v61  ;;  %v4691_v61 = vld [vmem:[%s5913_s25 + $0x74] ss:$8 sps:$4 sm:$0xff]  }
 0x6b5   : > { %2920 = vmatprep.subr.bf16.mxu0 %v4649_v63  ;;  %v4694_v63 = vld [vmem:[%s5913_s25 + $0x84] ss:$8 sps:$4 sm:$0xff]  }
 0x6b8   : > { %2921 = vmatpush1.bf16.msra.mxu0 %v4647_v1  ;;  %v4697_v1 = vld [vmem:[%s5913_s25 + $0x94] ss:$8 sps:$4 sm:$0xff]  }
 0x6b9   : > { %2922 = vmatprep.subr.bf16.mxu0 %v4655_v3  ;;  %v4700_v3 = vld [vmem:[%s5913_s25 + $0xa4] ss:$8 sps:$4 sm:$0xff]  }
 0x6bc   : > { %2923 = vmatpush1.bf16.msra.mxu0 %v4653_v5  ;;  %v4703_v5 = vld [vmem:[%s5913_s25 + $0xb4] ss:$8 sps:$4 sm:$0xff]  }
 0x6bd   : > { %2924 = vmatprep.subr.bf16.mxu0 %v4661_v9  ;;  %v4709_v9 = vld [vmem:[%s5913_s25 + $0xd4] ss:$8 sps:$4 sm:$0xff]  }
 0x6c0   : > { %2925 = vmatpush1.bf16.msra.mxu0 %v4659_v8  ;;  %v4704_v8 = vld [vmem:[%s5913_s25 + $0xc0] ss:$8 sps:$4 sm:$0xff]  }
 0x6c1   : > { %2926 = vmatprep.subr.bf16.mxu0 %v4667_v11  ;;  %v4712_v11 = vld [vmem:[%s5913_s25 + $0xe4] ss:$8 sps:$4 sm:$0xff]  }
 0x6c4   : > { %2927 = vmatpush1.bf16.msra.mxu0 %v4665_v13  ;;  %v4715_v13 = vld [vmem:[%s5913_s25 + $0xf4] ss:$8 sps:$4 sm:$0xff]  }
 0x73c   : > { %v2384_v37 = vpop.xlane.xlu0 %2383 }
 0x73d   : > { %v2389_v38 = vmul.f32 0.00390625, %v2384_v37 }
 0x73e   : > { %v2387_v39 = vpop.xlane.xlu1 %2386 }
 0x73f   : > { %v6178_v40 = vsub.f32 %v6125_v49, %v2389_v38  ;;  %v6181_v41 = vsub.f32 %v6127_v42, %v2389_v38  ;;  %v2390_v33 = vmul.f32 0.00390625, %v2387_v39 }
 0x741   : > { %v6184_v46 = vsub.f32 %v6129_v55, %v2390_v33  ;;  %v6187_v51 = vsub.f32 %v6131_v56, %v2390_v33  ;;  %v2395_v52 = vmul.f32 %v6178_v40, %v6178_v40  ;;  %v2396_v32 = vmul.f32 %v6181_v41, %v6181_v41  ;;  %v4634_v55 = vld [vmem:[%s5909_s24 + $0x144] ss:$16 sps:$4 sm:$0xff]   ;;  %v4632_v56 = vld [vmem:[%s5909_s24 + $0x140] ss:$16 sps:$4 sm:$0xff]  }
 0x742   : > { %2873 = vmatprep.subr.bf16.mxu1 %v4634_v55  ;;  %v4677_v55 = vld [vmem:[%s5913_s25 + $0x30] ss:$8 sps:$4 sm:$0xff]  }
 0x743   : > { %v2399_v49 = vadd.f32 %v2396_v32, %v2395_v52  ;;  %v2397_v42 = vmul.f32 %v6184_v46, %v6184_v46  ;;  %v2398_v53 = vmul.f32 %v6187_v51, %v6187_v51  ;;  %2874 = vmatpush1.bf16.msra.mxu1 %v4632_v56  ;;  %v4668_v52 = vld [vmem:[%s5913_s25] ss:$8 sps:$4 sm:$0xff]   ;;  %v4673_v32 = vld [vmem:[%s5913_s25 + $0x14] ss:$8 sps:$4 sm:$0xff]  }
 0x744   : > { %2875 = vmatprep.subr.bf16.mxu1 %v4640_v58  ;;  %v4680_v56 = vld [vmem:[%s5913_s25 + $0x40] ss:$8 sps:$4 sm:$0xff]   ;;  %v4683_v58 = vld [vmem:[%s5913_s25 + $0x50] ss:$8 sps:$4 sm:$0xff]  }
 0x745   : > { %2400 = vadd.xlane.f32.xlu0 %v2399_v49  ;;  %v2402_v54 = vadd.f32 %v2398_v53, %v2397_v42  ;;  %v4671_v49 = vld [vmem:[%s5913_s25 + $0x10] ss:$8 sps:$4 sm:$0xff]   ;;  %v4676_v42 = vld [vmem:[%s5913_s25 + $0x24] ss:$8 sps:$4 sm:$0xff]   ;;  %v4674_v53 = vld [vmem:[%s5913_s25 + $0x20] ss:$8 sps:$4 sm:$0xff]  }
 0x747   : > { %2403 = vadd.xlane.f32.xlu1 %v2402_v54  ;;  %2876 = vmatpush1.bf16.msra.mxu1 %v4638_v60  ;;  %v4679_v54 = vld [vmem:[%s5913_s25 + $0x34] ss:$8 sps:$4 sm:$0xff]   ;;  %v4686_v60 = vld [vmem:[%s5913_s25 + $0x60] ss:$8 sps:$4 sm:$0xff]  }
 0x748   : > { %2877 = vmatprep.subr.bf16.mxu1 %v4646_v62  ;;  %v4689_v62 = vld [vmem:[%s5913_s25 + $0x70] ss:$8 sps:$4 sm:$0xff]  }
 0x74b   : > { %2878 = vmatpush1.bf16.msra.mxu1 %v4644_v0  ;;  %v4692_v0 = vld [vmem:[%s5913_s25 + $0x80] ss:$8 sps:$4 sm:$0xff]  }
 0x74c   : > { %2879 = vmatprep.subr.bf16.mxu1 %v4652_v2  ;;  %v4695_v2 = vld [vmem:[%s5913_s25 + $0x90] ss:$8 sps:$4 sm:$0xff]  }
 0x74f   : > { %2880 = vmatpush1.bf16.msra.mxu1 %v4650_v4  ;;  %v4698_v4 = vld [vmem:[%s5913_s25 + $0xa0] ss:$8 sps:$4 sm:$0xff]  }
 0x750   : > { %2881 = vmatprep.subr.bf16.mxu1 %v4658_v7  ;;  %v4706_v7 = vld [vmem:[%s5913_s25 + $0xc4] ss:$8 sps:$4 sm:$0xff]  }
 0x753   : > { %2882 = vmatpush1.bf16.msra.mxu1 %v4656_v6  ;;  %v4701_v6 = vld [vmem:[%s5913_s25 + $0xb0] ss:$8 sps:$4 sm:$0xff]  }
 0x754   : > { %2883 = vmatprep.subr.bf16.mxu1 %v4664_v10  ;;  %v4707_v10 = vld [vmem:[%s5913_s25 + $0xd0] ss:$8 sps:$4 sm:$0xff]  }
 0x757   : > { %2884 = vmatpush1.bf16.msra.mxu1 %v4662_v12  ;;  %v4710_v12 = vld [vmem:[%s5913_s25 + $0xe0] ss:$8 sps:$4 sm:$0xff]  }
 0x758   : > { %3347 = vmatprep.subr.bf16.mxu1 %v4670_v14  ;;  %v4713_v14 = vld [vmem:[%s5913_s25 + $0xf0] ss:$8 sps:$4 sm:$0xff]  }
 0x7d2   : > { %v2401_v15 = vpop.xlane.xlu0 %2400 }
 0x7d3   : > { %v2405_v16 = vmul.f32 0.00390625, %v2401_v15  ;;  %v4718_v15 = vld [vmem:[%s5913_s25 + $0x104] ss:$8 sps:$4 sm:$0xff]  }
 0x7d4   : > { %v2404_v17 = vpop.xlane.xlu1 %2403 }
 0x7d5   : > { %v2407_v18 = vadd.f32 1e-05, %v2405_v16  ;;  %v2406_v19 = vmul.f32 0.00390625, %v2404_v17  ;;  %v2511_v16 = vld [vmem:[%s5911_s0] sm:$0xf] }
 0x7d6   : > { %v2516_v17 = vrot.slane %v2511_v16, %v6033_v48 }
 0x7d7   : > { %4780 = vrsqrt.f32 %v2407_v18  ;;  %v2408_v20 = vadd.f32 1e-05, %v2406_v19  ;;  %v2524_v18 = vrot.slane %v2511_v16, %v1056_v45  ;;  %v2520_v19 = vrot.slane %v2511_v16, %v6038_v50 }
 0x7d9   : > { %4782 = vrsqrt.f32 %v2408_v20  ;;  %v2528_v20 = vrot.slane %v2511_v16, %v1060_v47  ;;  %v4757_v16 = vld [vmem:[%s5913_s25 + $0x1d4] ss:$8 sps:$4 sm:$0xff]  }
 0x7e1   : > { %v4781_v25 = vpop.eup %4780 }
 0x7e2   : > { %v2411_v26 = vmul.f32 %v4781_v25, %v6178_v40  ;;  %v2412_v27 = vmul.f32 %v4781_v25, %v6181_v41 }
 0x7e3   : > { %v4783_v28 = vpop.eup %4782 }
 0x7e4   : > { %v2413_v31 = vmul.f32 %v4783_v28, %v6184_v46  ;;  %v2414_v34 = vmul.f32 %v4783_v28, %v6187_v51  ;;  %v2427_v35 = vmul.f32 %v2423_v24, %v2412_v27  ;;  %v2426_v36 = vmul.f32 %v2419_v23, %v2411_v26 }
 0x7e6   : > { %v2429_v37 = vmul.f32 %v2423_v24, %v2414_v34  ;;  %v2428_v38 = vmul.f32 %v2419_v23, %v2413_v31  ;;  %v6234_v39 = vadd.f32 %v2438_v30, %v2427_v35  ;;  %v6238_v41 = vadd.f32 %v2434_v29, %v2426_v36 }
 0x7e8   : > { %v6236_v40 = vadd.f32 %v2438_v30, %v2429_v37  ;;  %v6240_v33 = vadd.f32 %v2434_v29, %v2428_v38 }
 0x7ea   : > { %v2446_v46 = vpack.c.bf16 %v6236_v40, %v6234_v39  ;;  %v2445_v51 = vpack.c.bf16 %v6240_v33, %v6238_v41 }
 0x7ec   : > { %2885 = vmatprep.mubr.bf16.mxu1 %v2446_v46  ;;  %2928 = vmatprep.mubr.bf16.mxu0 %v2446_v46 }
 0x7ed   : > { %2886 = vmatmul.mubr.bf16.vlgmr.msra.gmra.mrb[20].mxu1 %v2445_v51  ;;  %2929 = vmatmul.mubr.bf16.vlgmr.msra.gmra.mrb[28].mxu0 %v2445_v51 }
 0x7ee   : > { %3348 = vmatpush1.bf16.msra.mxu1 %v4668_v52 }
 0x7ef   : > { %3349 = vmatprep.subr.bf16.mxu1 %v4673_v32 }
 0x7f2   : > { %3350 = vmatpush1.bf16.msra.mxu1 %v4671_v49 }
 0x7f3   : > { %3351 = vmatprep.subr.bf16.mxu1 %v4676_v42 }
 0x7f6   : > { %3352 = vmatpush1.bf16.msra.mxu1 %v4674_v53 }
 0x7f7   : > { %3353 = vmatprep.subr.bf16.mxu1 %v4679_v54 }
 0x7fa   : > { %3354 = vmatpush1.bf16.msra.mxu1 %v4677_v55 }
 0x7fb   : > { %3355 = vmatprep.subr.bf16.mxu1 %v4682_v43  ;;  %v4716_v43 = vld [vmem:[%s5913_s25 + $0x100] ss:$8 sps:$4 sm:$0xff]  }
 0x7fe   : > { %3356 = vmatpush1.bf16.msra.mxu1 %v4680_v56  ;;  %v4721_v56 = vld [vmem:[%s5913_s25 + $0x114] ss:$8 sps:$4 sm:$0xff]  }
 0x7ff   : > { %3357 = vmatprep.subr.bf16.mxu1 %v4685_v57  ;;  %v4719_v57 = vld [vmem:[%s5913_s25 + $0x110] ss:$8 sps:$4 sm:$0xff]  }
 0x802   : > { %3358 = vmatpush1.bf16.msra.mxu1 %v4683_v58  ;;  %v4724_v58 = vld [vmem:[%s5913_s25 + $0x124] ss:$8 sps:$4 sm:$0xff]  }
 0x803   : > { %3359 = vmatprep.subr.bf16.mxu1 %v4688_v59  ;;  %v4722_v59 = vld [vmem:[%s5913_s25 + $0x120] ss:$8 sps:$4 sm:$0xff]  }
 0x806   : > { %3360 = vmatpush1.bf16.msra.mxu1 %v4686_v60  ;;  %v4727_v60 = vld [vmem:[%s5913_s25 + $0x134] ss:$8 sps:$4 sm:$0xff]  }
 0x807   : > { %3361 = vmatprep.subr.bf16.mxu1 %v4691_v61  ;;  %v4725_v61 = vld [vmem:[%s5913_s25 + $0x130] ss:$8 sps:$4 sm:$0xff]  }
 0x80a   : > { %3362 = vmatpush1.bf16.msra.mxu1 %v4689_v62  ;;  %v4730_v62 = vld [vmem:[%s5913_s25 + $0x144] ss:$8 sps:$4 sm:$0xff]  }
 0x80b   : > { %3363 = vmatprep.subr.bf16.mxu1 %v4694_v63  ;;  %v4728_v63 = vld [vmem:[%s5913_s25 + $0x140] ss:$8 sps:$4 sm:$0xff]  }
 0x80e   : > { %3364 = vmatpush1.bf16.msra.mxu1 %v4692_v0  ;;  %v4733_v0 = vld [vmem:[%s5913_s25 + $0x154] ss:$8 sps:$4 sm:$0xff]  }
 0x80f   : > { %3365 = vmatprep.subr.bf16.mxu1 %v4697_v1  ;;  %v4731_v1 = vld [vmem:[%s5913_s25 + $0x150] ss:$8 sps:$4 sm:$0xff]  }
 0x812   : > { %3366 = vmatpush1.bf16.msra.mxu1 %v4695_v2  ;;  %v4736_v2 = vld [vmem:[%s5913_s25 + $0x164] ss:$8 sps:$4 sm:$0xff]  }
 0x813   : > { %3367 = vmatprep.subr.bf16.mxu1 %v4700_v3  ;;  %v4734_v3 = vld [vmem:[%s5913_s25 + $0x160] ss:$8 sps:$4 sm:$0xff]  }
 0x816   : > { %3368 = vmatpush1.bf16.msra.mxu1 %v4698_v4  ;;  %v4739_v4 = vld [vmem:[%s5913_s25 + $0x174] ss:$8 sps:$4 sm:$0xff]  }
 0x817   : > { %3369 = vmatprep.subr.bf16.mxu1 %v4703_v5  ;;  %v4737_v5 = vld [vmem:[%s5913_s25 + $0x170] ss:$8 sps:$4 sm:$0xff]  }
 0x81a   : > { %3370 = vmatpush1.bf16.msra.mxu1 %v4701_v6  ;;  %v4742_v6 = vld [vmem:[%s5913_s25 + $0x184] ss:$8 sps:$4 sm:$0xff]  }
 0x81b   : > { %3371 = vmatprep.subr.bf16.mxu1 %v4706_v7  ;;  %v4740_v7 = vld [vmem:[%s5913_s25 + $0x180] ss:$8 sps:$4 sm:$0xff]  }
 0x81e   : > { %3372 = vmatpush1.bf16.msra.mxu1 %v4704_v8  ;;  %v4745_v8 = vld [vmem:[%s5913_s25 + $0x194] ss:$8 sps:$4 sm:$0xff]  }
 0x81f   : > { %3373 = vmatprep.subr.bf16.mxu1 %v4709_v9  ;;  %v4743_v9 = vld [vmem:[%s5913_s25 + $0x190] ss:$8 sps:$4 sm:$0xff]  }
 0x822   : > { %3374 = vmatpush1.bf16.msra.mxu1 %v4707_v10  ;;  %v4748_v10 = vld [vmem:[%s5913_s25 + $0x1a4] ss:$8 sps:$4 sm:$0xff]  }
 0x823   : > { %3375 = vmatprep.subr.bf16.mxu1 %v4712_v11  ;;  %v4746_v11 = vld [vmem:[%s5913_s25 + $0x1a0] ss:$8 sps:$4 sm:$0xff]  }
 0x826   : > { %3376 = vmatpush1.bf16.msra.mxu1 %v4710_v12  ;;  %v4751_v12 = vld [vmem:[%s5913_s25 + $0x1b4] ss:$8 sps:$4 sm:$0xff]  }
 0x827   : > { %3377 = vmatprep.subr.bf16.mxu1 %v4715_v13  ;;  %v4749_v13 = vld [vmem:[%s5913_s25 + $0x1b0] ss:$8 sps:$4 sm:$0xff]  }
 0x82a   : > { %3378 = vmatpush1.bf16.msra.mxu1 %v4713_v14  ;;  %v4754_v14 = vld [vmem:[%s5913_s25 + $0x1c4] ss:$8 sps:$4 sm:$0xff]  }
 0x82b   : > { %3390 = vmatprep.subr.bf16.mxu1 %v4718_v15  ;;  %v4752_v15 = vld [vmem:[%s5913_s25 + $0x1c0] ss:$8 sps:$4 sm:$0xff]  }
 0x8c0   : > { %v2887_v21 = vpop.f32.mrb[20].mxu1  ;;  %v2930_v22 = vpop.f32.mrb[28].mxu0 }
 0x8c1   : > { %v2888_v23 = vadd.f32 %v2887_v21, %v2516_v17  ;;  %v2931_v24 = vadd.f32 %v2930_v22, %v2524_v18  ;;  %v2889_v25 = vpop.f32.mrb[21].mxu1  ;;  %v2932_v26 = vpop.f32.mrb[29].mxu0  ;;  %v4761_v21 = vld [vmem:[%s5913_s25 + $0x1f0] ss:$8 sps:$4 sm:$0xff]   ;;  %v3015_v22 = vld [vmem:[%s813_s21] sm:$0x3] }
 0x8c2   : > { %v2890_v27 = vadd.f32 %v2889_v25, %v2520_v19  ;;  %v2933_v28 = vadd.f32 %v2932_v26, %v2528_v20  ;;  %v2891_v29 = vpop.f32.mrb[22].mxu1  ;;  %v2934_v30 = vpop.f32.mrb[30].mxu0 }
 0x8c3   : > { %v2892_v31 = vadd.f32 %v2891_v29, %v2516_v17  ;;  %v2935_v34 = vadd.f32 %v2934_v30, %v2524_v18  ;;  %v2893_v35 = vpop.f32.mrb[23].mxu1  ;;  %v2936_v45 = vpop.f32.mrb[31].mxu0  ;;  %v2939_v44 = vmax.f32 %v2888_v23, 0.0  ;;  %v2941_v47 = vmax.f32 %v2931_v24, 0.0  ;;  %v4755_v17 = vld [vmem:[%s5913_s25 + $0x1d0] ss:$8 sps:$4 sm:$0xff]  }
 0x8c4   : > { %v2894_v36 = vadd.f32 %v2893_v35, %v2520_v19  ;;  %v2937_v37 = vadd.f32 %v2936_v45, %v2528_v20  ;;  %v2940_v51 = vmax.f32 %v2890_v27, 0.0  ;;  %v2942_v52 = vmax.f32 %v2933_v28, 0.0  ;;  %v4760_v18 = vld [vmem:[%s5913_s25 + $0x1e4] ss:$8 sps:$4 sm:$0xff]   ;;  %v4758_v19 = vld [vmem:[%s5913_s25 + $0x1e0] ss:$8 sps:$4 sm:$0xff]  }
 0x8c5   : > { %v2943_v38 = vmax.f32 %v2892_v31, 0.0  ;;  %v2945_v46 = vmax.f32 %v2935_v34, 0.0  ;;  %v4763_v20 = vld [vmem:[%s5913_s25 + $0x1f4] ss:$8 sps:$4 sm:$0xff]   ;;  %v3020_v23 = vrot.slane %v3015_v22, %v6033_v48  ;;  %v3024_v24 = vrot.slane %v3015_v22, %v6038_v50 }
 0x8c6   : > { %v2944_v32 = vmax.f32 %v2894_v36, 0.0  ;;  %v2946_v49 = vmax.f32 %v2937_v37, 0.0 }
 0x8c7   : > { %v2947_v42 = vpack.c.bf16 %v2943_v38, %v2939_v44  ;;  %v6285_v53 = vpack.c.bf16 %v2945_v46, %v2941_v47 }
 0x8c8   : > { %v2948_v54 = vpack.c.bf16 %v2944_v32, %v2940_v51  ;;  %v2950_v55 = vpack.c.bf16 %v2946_v49, %v2942_v52 }
 0x8ca   : > { %3379 = vmatprep.mubr.bf16.mxu1 %v2948_v54 }
 0x8cb   : > { %3380 = vmatmul.mubr.bf16.vlgmr.msra.gmra.mrb[24].mxu1 %v2947_v42 }
 0x8cc   : > { %3391 = vmatpush1.bf16.msra.mxu1 %v4716_v43  ;;  %3422 = vmatprep.mubr.bf16.mxu1 %v2950_v55 }
 0x8cd   : > { %3392 = vmatprep.subr.bf16.mxu1 %v4721_v56 }
 0x8d0   : > { %3393 = vmatpush1.bf16.msra.mxu1 %v4719_v57 }
 0x8d1   : > { %3394 = vmatprep.subr.bf16.mxu1 %v4724_v58 }
 0x8d4   : > { %3395 = vmatpush1.bf16.msra.mxu1 %v4722_v59 }
 0x8d5   : > { %3396 = vmatprep.subr.bf16.mxu1 %v4727_v60 }
 0x8d8   : > { %3397 = vmatpush1.bf16.msra.mxu1 %v4725_v61  ;;  %v3437_v61 = vld [vmem:[%s822_s16] sm:$0x3] }
 0x8d9   : > { %3398 = vmatprep.subr.bf16.mxu1 %v4730_v62  ;;  %v3438_v62 = vld [vmem:[%s831_s30] sm:$0x3] }
 0x8dc   : > { %3399 = vmatpush1.bf16.msra.mxu1 %v4728_v63  ;;  %v3475_v63 = vrot.slane %v3437_v61, %v6033_v48 }
 0x8dd   : > { %3400 = vmatprep.subr.bf16.mxu1 %v4733_v0  ;;  %v3479_v0 = vrot.slane %v3437_v61, %v6038_v50 }
 0x8e0   : > { %3401 = vmatpush1.bf16.msra.mxu1 %v4731_v1 }
 0x8e1   : > { %3402 = vmatprep.subr.bf16.mxu1 %v4736_v2  ;;  %v3490_v2 = vrot.slane %v3438_v62, %v6033_v48 }
 0x8e4   : > { %3403 = vmatpush1.bf16.msra.mxu1 %v4734_v3  ;;  %v3494_v3 = vrot.slane %v3438_v62, %v6038_v50 }
 0x8e5   : > { %3404 = vmatprep.subr.bf16.mxu1 %v4739_v4 }
 0x8e8   : > { %3405 = vmatpush1.bf16.msra.mxu1 %v4737_v5 }
 0x8e9   : > { %3406 = vmatprep.subr.bf16.mxu1 %v4742_v6 }
 0x8ec   : > { %3407 = vmatpush1.bf16.msra.mxu1 %v4740_v7 }
 0x8ed   : > { %3408 = vmatprep.subr.bf16.mxu1 %v4745_v8 }
 0x8f0   : > { %3409 = vmatpush1.bf16.msra.mxu1 %v4743_v9 }
 0x8f1   : > { %3410 = vmatprep.subr.bf16.mxu1 %v4748_v10 }
 0x8f4   : > { %3411 = vmatpush1.bf16.msra.mxu1 %v4746_v11 }
 0x8f5   : > { %3412 = vmatprep.subr.bf16.mxu1 %v4751_v12 }
 0x8f8   : > { %3413 = vmatpush1.bf16.msra.mxu1 %v4749_v13 }
 0x8f9   : > { %3414 = vmatprep.subr.bf16.mxu1 %v4754_v14 }
 0x8fc   : > { %3415 = vmatpush1.bf16.msra.mxu1 %v4752_v15 }
 0x8fd   : > { %3416 = vmatprep.subr.bf16.mxu1 %v4757_v16 }
 0x900   : > { %3417 = vmatpush1.bf16.msra.mxu1 %v4755_v17 }
 0x901   : > { %3418 = vmatprep.subr.bf16.mxu1 %v4760_v18 }
 0x904   : > { %3419 = vmatpush1.bf16.msra.mxu1 %v4758_v19 }
 0x905   : > { %3420 = vmatprep.subr.bf16.mxu1 %v4763_v20 }
 0x908   : > { %3421 = vmatpush1.bf16.msra.mxu1 %v4761_v21 }
 0x90b   : > { %3423 = vmatmul.mubr.bf16.vlgmr.msra.gmra.mrb[24].mxu1 %v6285_v53 }
 0x9de   : > { %v3424_v25 = vpop.f32.mrb[24].mxu1 }
 0x9df   : > { %v4217_v26 = vadd.f32 %v3424_v25, %v3020_v23  ;;  %v3426_v27 = vpop.f32.mrb[25].mxu1 }
 0x9e0   : > { %v4218_v28 = vadd.f32 %v3426_v27, %v3024_v24  ;;  %v3428_v29 = vpop.f32.mrb[26].mxu1 }
 0x9e1   : > { %v3433_v30 = vadd.f32 %v4217_v26, %v6238_v41  ;;  %v4219_v31 = vadd.f32 %v3428_v29, %v3020_v23  ;;  %v3430_v34 = vpop.f32.mrb[27].mxu1 }
 0x9e2   : > { %v3434_v35 = vadd.f32 %v4218_v28, %v6234_v39  ;;  %v4220_v45 = vadd.f32 %v3430_v34, %v3024_v24 }
 0x9e3   : > { %v3435_v36 = vadd.f32 %v4219_v31, %v6240_v33 }
 0x9e4   : > { %v3436_v37 = vadd.f32 %v4220_v45, %v6236_v40  ;;  %v3439_v44 = vadd.f32 %v3434_v35, %v3433_v30 }
 0x9e6   : > { %3440 = vadd.xlane.f32.xlu0 %v3439_v44  ;;  %v3442_v47 = vadd.f32 %v3436_v37, %v3435_v36 }
 0x9e8   : > { %3443 = vadd.xlane.f32.xlu1 %v3442_v47 }
 0xa73   : > { %v3441_v38 = vpop.xlane.xlu0 %3440 }
 0xa74   : > { %v3445_v46 = vmul.f32 0.00390625, %v3441_v38 }
 0xa75   : > { %v3444_v51 = vpop.xlane.xlu1 %3443 }
 0xa76   : > { %v3447_v52 = vsub.f32 %v3433_v30, %v3445_v46  ;;  %v3448_v32 = vsub.f32 %v3434_v35, %v3445_v46  ;;  %v3446_v49 = vmul.f32 0.00390625, %v3444_v51 }
 0xa78   : > { %v3449_v41 = vsub.f32 %v3435_v36, %v3446_v49  ;;  %v3450_v42 = vsub.f32 %v3436_v37, %v3446_v49  ;;  %v3451_v53 = vmul.f32 %v3447_v52, %v3447_v52  ;;  %v3452_v39 = vmul.f32 %v3448_v32, %v3448_v32 }
 0xa7a   : > { %v3455_v54 = vadd.f32 %v3452_v39, %v3451_v53  ;;  %v3453_v33 = vmul.f32 %v3449_v41, %v3449_v41  ;;  %v3454_v55 = vmul.f32 %v3450_v42, %v3450_v42 }
 0xa7c   : > { %3456 = vadd.xlane.f32.xlu0 %v3455_v54  ;;  %v3458_v40 = vadd.f32 %v3454_v55, %v3453_v33 }
 0xa7e   : > { %3459 = vadd.xlane.f32.xlu1 %v3458_v40 }
 0xb09   : > { %v3457_v43 = vpop.xlane.xlu0 %3456 }
 0xb0a   : > { %v3461_v56 = vmul.f32 0.00390625, %v3457_v43 }
 0xb0b   : > { %v3460_v57 = vpop.xlane.xlu1 %3459 }
 0xb0c   : > { %v3463_v58 = vadd.f32 1e-05, %v3461_v56  ;;  %v3462_v59 = vmul.f32 0.00390625, %v3460_v57 }
 0xb0e   : > { %4784 = vrsqrt.f32 %v3463_v58  ;;  %v3464_v60 = vadd.f32 1e-05, %v3462_v59 }
 0xb10   : > { %4786 = vrsqrt.f32 %v3464_v60 }
 0xb18   : > { %v4785_v1 = vpop.eup %4784 }
 0xb19   : > { %v3467_v4 = vmul.f32 %v4785_v1, %v3447_v52  ;;  %v3468_v5 = vmul.f32 %v4785_v1, %v3448_v32 }
 0xb1a   : > { %v4787_v6 = vpop.eup %4786 }
 0xb1b   : > { %v3482_v7 = vmul.f32 %v3475_v63, %v3467_v4  ;;  %v3483_v8 = vmul.f32 %v3479_v0, %v3468_v5  ;;  %v3469_v9 = vmul.f32 %v4787_v6, %v3449_v41  ;;  %v3470_v10 = vmul.f32 %v4787_v6, %v3450_v42 }
 0xb1d   : > { %v3497_v11 = vadd.f32 %v3490_v2, %v3482_v7  ;;  %v3498_v12 = vadd.f32 %v3494_v3, %v3483_v8  ;;  %v3484_v13 = vmul.f32 %v3475_v63, %v3469_v9  ;;  %v3485_v14 = vmul.f32 %v3479_v0, %v3470_v10 }
 0xb1f   : > { %3501 = vst [vmem:[#allocation19] sm:$0xff] %v3497_v11  ;;  %3502 = vst [vmem:[#allocation19 + $0x8] sm:$0xff] %v3498_v12  ;;  %v3499_v48 = vadd.f32 %v3490_v2, %v3484_v13  ;;  %v3500_v50 = vadd.f32 %v3494_v3, %v3485_v14 }
 0xb21   : > { %3503 = vst [vmem:[#allocation19 + $0x10] sm:$0xff] %v3499_v48  ;;  %3504 = vst [vmem:[#allocation19 + $0x18] sm:$0xff] %v3500_v50 }
 0xb22   : > { %5221 = shalt.err (!%p5218_p9)
}
 0xb23   : > { %s6484_s20 = sld [smem:[#allocation39_spill]] }
 0xb29   : > { %s5222_s2 = scalar_lea.hbm %s6484_s20, 512 }
 0xb2a   : > { %p5223_p4 = scmp.ne.s32.totalorder %s6484_s20, %s5222_s2  ;;  %p5228_p7 = scmp.lt.u32.totalorder %s5222_s2, %s6484_s20 }
 0xb2c   : > { %p5224_p0 = pnand %p5223_p4, %p4316_p5 }
 0xb2e   : > { %p5225_p6 = pneg %p5224_p0 }
 0xb30   : > { %p5230_p3 = pnand %p5228_p7, %p5225_p6 }
 0xb32   : > { %5233 = shalt.err (!%p5230_p3)
}
 0xb33   : > { %s5322_s24 = smov 256   ;;  %s5323_s0 = smov 16  }
 0xb34   : > { %4264 = dma.vmem_to_hbm [thread:$0]  (%p4316_p5), %s3516_s18, 512, %s6484_s20, [#allocation4], %s5322_s24, %s5322_s24, %s5323_s0  }
 0xb35   : > { %5271 = dma.done.wait (%p4316_p5), [#allocation4], 512  }
 0xb36   : > { %5273 = vsyncadd (%p4316_p5), [#allocation4], 4294966784 }
 0xb37 PF: > { %s6485_s16 = sld [smem:[#allocation27_spill]]  ;;  %s6486_s29 = sld [smem:[#allocation24_spill]] }
 0xb38   : > { %s6487_s30 = sld [smem:[#allocation25_spill]]  ;;  %s6488_s15 = sld [smem:[#allocation31_spill]] }
 0xb39   : > { %s6489_s26 = sld [smem:[#allocation29_spill]] }
 0xb3d   : > { %s27_s18 = sadd.s32 1, %s6485_s16   ;;  %s6490_s16 = smov %s5292_s17 }
 0xb3e   : > { %p24_p13 = scmp.ge.s32.totalorder %s27_s18, 4  }
 0xb3f   : > { %s6491_s17 = smov %s6489_s26 }
 0xb40   :  { %26 = sbr.rel (!%p24_p13) target bundleno = 12 (0xc), region = 248 }
 0xb47   :  { %3531 = vsyncpa [#allocation3], 1 }
 0xb48   :  { %3533 = vsyncpa [#allocation3 + $0x1], 1 }
 0xb49   :  { %3534 = vsyncpa [#allocation6], 1 }
 0xb4a   :  { %3535 = vsyncpa [#allocation4], 1 }
 0xb4b   :  { %3537 = vsyncpa [#allocation4 + $0x1], 1 }

</bundles_post_ra>
